<compile_context>
chip_gen: v6e
topology: v6e:2x2x1
jax: 0.10.0
libtpu: 0.0.40
codegen_flags: <defaults>
</compile_context>

<pallas_src>
import functools

import jax
import jax.numpy as jnp
from jax.experimental import pallas as pl
from jax.experimental.pallas import tpu as pltpu


# ------------------------------ shared math ---------------------------------

def _layernorm(x, g, b, eps=1e-5):
    mu = jnp.mean(x, axis=-1, keepdims=True)
    xc = x - mu
    var = jnp.mean(xc * xc, axis=-1, keepdims=True)        # biased, like torch
    return xc * jax.lax.rsqrt(var + eps) * g + b


def _gating_math(x, y, wy, by, wx, bx, wu, bu, bg):
    # GRU-style GTrXL gate.  wy = [Wr|Wz|Wg] (D,3D), wx = [Ur|Uz] (D,2D), wu = Ug.
    D = x.shape[-1]
    yy = jnp.dot(y, wy, preferred_element_type=jnp.float32) + by     # (N, 3D)
    xx = jnp.dot(x, wx, preferred_element_type=jnp.float32) + bx     # (N, 2D)

    def sig(t):
        return 1.0 / (1.0 + jnp.exp(-t))

    r = sig(yy[:, :D] + xx[:, :D])
    z = sig(yy[:, D:2 * D] + xx[:, D:2 * D] - bg)
    h = jnp.tanh(yy[:, 2 * D:] +
                 jnp.dot(r * x, wu, preferred_element_type=jnp.float32) + bu)
    return (1.0 - z) * x + z * h


# ---------------- fused LN1 + MHA-XL + out-proj + gate1 kernel ---------------

def _attn_gate_kernel(*refs, n_heads, d_head, prev_len, scale, bg):
    if prev_len > 0:
        (x_ref, mem_ref, pos_ref, pad_ref, wq_ref, wkv_ref, wp_ref, wout_ref,
         u_ref, vb_ref, g1_ref, b1_ref, gwy_ref, gby_ref, gwx_ref, gbx_ref,
         gwu_ref, gbu_ref, o_ref) = refs
    else:
        (x_ref, pos_ref, pad_ref, wq_ref, wkv_ref, wp_ref, wout_ref,
         u_ref, vb_ref, g1_ref, b1_ref, gwy_ref, gby_ref, gwx_ref, gbx_ref,
         gwu_ref, gbu_ref, o_ref) = refs
        mem_ref = None

    H, d, P = n_heads, d_head, prev_len
    T = x_ref.shape[1]
    S = T + P
    Hd = H * d

    x = x_ref[0]                                           # (T, D), pre-LN input
    xn = _layernorm(x, g1_ref[...], b1_ref[...])           # norm1

    if P > 0:
        xm = jnp.concatenate([mem_ref[0], xn], axis=0)     # (S, D): raw memory + normed x
    else:
        xm = xn

    # projections (bias-free, as in the torch module)
    q_all = jnp.dot(xn, wq_ref[...], preferred_element_type=jnp.float32)        # (T, Hd)
    kv_all = jnp.dot(xm, wkv_ref[...], preferred_element_type=jnp.float32)      # (S, 2Hd)
    p_all = jnp.dot(pos_ref[...], wp_ref[...], preferred_element_type=jnp.float32)  # (S, Hd)
    u_all = u_ref[...]                                      # (H, d)
    v_all = vb_ref[...]                                     # (H, d)
    w_out = wout_ref[...]                                   # (Hd, D)

    # mask built in-kernel: causal (j > i + P) OR key-padding
    row = jax.lax.broadcasted_iota(jnp.int32, (T, S), 0)
    col = jax.lax.broadcasted_iota(jnp.int32, (T, S), 1)
    masked = (col > row + P) | (pad_ref[0] > 0)             # (T,S) | (1,S) -> (T,S)

    dn = (((1,), (1,)), ((), ()))                           # contract on d, no transpose

    y = jnp.zeros((T, x.shape[-1]), jnp.float32)            # projected attention output
    for h in range(H):
        hs = slice(h * d, (h + 1) * d)
        q_h = q_all[:, hs]                                  # (T, d)
        k_h = kv_all[:, hs]                                 # (S, d)
        v_h = kv_all[:, Hd + h * d: Hd + (h + 1) * d]       # (S, d)
        p_h = p_all[:, hs]                                  # (S, d)

        # one MXU pass for both score terms: q @ [k|p]^T  -> (T, 2S)
        kp = jnp.concatenate([k_h, p_h], axis=0)            # (2S, d)
        qkp = jax.lax.dot_general(q_h, kp, dn, preferred_element_type=jnp.float32)
        uk = jax.lax.dot_general(u_all[h:h + 1, :], k_h, dn,
                                 preferred_element_type=jnp.float32)   # (1, S)
        vp = jax.lax.dot_general(v_all[h:h + 1, :], p_h, dn,
                                 preferred_element_type=jnp.float32)   # (1, S)

        content = qkp[:, :S] + uk
        pos_raw = qkp[:, S:] + vp

        # Transformer-XL relative shift on the (T,S) tile in VMEM:
        #   shifted[i, j] = pos_raw[i, j + (T - 1 - i)]
        # (out-of-range entries fall in the causally-masked region -> irrelevant)
        shifted = jnp.zeros_like(pos_raw)
        for s_amt in range(T):
            if s_amt == 0:
                cand = pos_raw
            else:
                cand = jnp.concatenate(
                    [pos_raw[:, s_amt:], jnp.zeros((T, s_amt), jnp.float32)],
                    axis=1)
            shifted = jnp.where(row == (T - 1 - s_amt), cand, shifted)

        s_scores = jnp.where(masked, -jnp.inf, content + shifted) * scale
        mx = jnp.max(s_scores, axis=-1, keepdims=True)
        e = jnp.exp(s_scores - mx)
        denom = jnp.sum(e, axis=-1, keepdims=True)
        attn = e * pl.reciprocal(denom, approx=True)

        av = jnp.dot(attn, v_h, preferred_element_type=jnp.float32)     # (T, d)
        y = y + jnp.dot(av, w_out[h * d:(h + 1) * d, :],
                        preferred_element_type=jnp.float32)             # (T, D)

    # GRU gate #1: gate1(original input, attention output)
    g_out = _gating_math(x, y, gwy_ref[...], gby_ref[...], gwx_ref[...],
                         gbx_ref[...], gwu_ref[...], gbu_ref[...], bg)
    o_ref[...] = g_out[None]


def attention_gate_layer(p, u, v, x_btd, mem_bpd, pos_emb, pad_b1s,
                         n_heads, d_head, bg=0.1):
    B, T, D = x_btd.shape
    P = 0 if mem_bpd is None else mem_bpd.shape[1]
    S = T + P
    H, d = n_heads, d_head
    scale = 1.0 / (d ** 0.5)

    kernel = functools.partial(_attn_gate_kernel, n_heads=H, d_head=d,
                               prev_len=P, scale=scale, bg=bg)

    in_specs = [pl.BlockSpec((1, T, D), lambda b: (b, 0, 0))]
    inputs = [x_btd]
    if P > 0:
        in_specs.append(pl.BlockSpec((1, P, D), lambda b: (b, 0, 0)))
        inputs.append(mem_bpd)
    in_specs += [
        pl.BlockSpec((S, D), lambda b: (0, 0)),            # pos_emb
        pl.BlockSpec((1, 1, S), lambda b: (b, 0, 0)),      # key-padding vector
        pl.BlockSpec((D, H * d), lambda b: (0, 0)),        # w_q
        pl.BlockSpec((D, 2 * H * d), lambda b: (0, 0)),    # w_kv
        pl.BlockSpec((D, H * d), lambda b: (0, 0)),        # w_p
        pl.BlockSpec((H * d, D), lambda b: (0, 0)),        # w_out
        pl.BlockSpec((H, d), lambda b: (0, 0)),            # u
        pl.BlockSpec((H, d), lambda b: (0, 0)),            # v
        pl.BlockSpec((1, D), lambda b: (0, 0)),            # ln1_g
        pl.BlockSpec((1, D), lambda b: (0, 0)),            # ln1_b
        pl.BlockSpec((D, 3 * D), lambda b: (0, 0)),        # gate1 [Wr|Wz|Wg]
        pl.BlockSpec((1, 3 * D), lambda b: (0, 0)),
        pl.BlockSpec((D, 2 * D), lambda b: (0, 0)),        # gate1 [Ur|Uz]
        pl.BlockSpec((1, 2 * D), lambda b: (0, 0)),
        pl.BlockSpec((D, D), lambda b: (0, 0)),            # gate1 Ug
        pl.BlockSpec((1, D), lambda b: (0, 0)),
    ]
    inputs += [pos_emb, pad_b1s, p['w_q'], p['w_kv'], p['w_p'], p['w_out'],
               u, v, p['ln1_g'], p['ln1_b'],
               p['g1_wy'], p['g1_by'], p['g1_wx'], p['g1_bx'],
               p['g1_wu'], p['g1_bu']]

    return pl.pallas_call(
        kernel,
        out_shape=jax.ShapeDtypeStruct((B, T, D), jnp.float32),
        grid=(B,),
        in_specs=in_specs,
        out_specs=pl.BlockSpec((1, T, D), lambda b: (b, 0, 0)),
        compiler_params=pltpu.CompilerParams(
            dimension_semantics=("parallel",),
            vmem_limit_bytes=32 * 1024 * 1024),
    )(*inputs)


# ------------------- fused LN2 + FFN + gate2 kernel (row-tiled) --------------

def _ff_gate_kernel(x_ref, g_ref, b_ref, w1_ref, b1_ref, w2_ref, b2_ref,
                    gwy_ref, gby_ref, gwx_ref, gbx_ref, gwu_ref, gbu_ref,
                    o_ref, *, bg):
    x = x_ref[...]                                          # (TN, D) rows of `src`
    xn = _layernorm(x, g_ref[...], b_ref[...])              # norm2
    h = jnp.dot(xn, w1_ref[...], preferred_element_type=jnp.float32) + b1_ref[...]
    h = jnp.maximum(h, 0.0)                                 # ReLU
    y = jnp.dot(h, w2_ref[...], preferred_element_type=jnp.float32) + b2_ref[...]
    o_ref[...] = _gating_math(x, y, gwy_ref[...], gby_ref[...], gwx_ref[...],
                              gbx_ref[...], gwu_ref[...], gbu_ref[...], bg)


def _row_tile(n):
    if n <= 8:
        return n
    # >=2 grid steps (keeps both v7x TensorCores busy); tiles are multiples of 8
    half = (((n + 1) // 2) + 7) // 8 * 8
    return max(8, min(256, half, n))


def ff_gate_block(p, src_btd, bg=0.1):
    B, T, D = src_btd.shape
    N = B * T
    F = p['ff_w1'].shape[1]
    x = src_btd.reshape(N, D)
    TN = _row_tile(N)

    out = pl.pallas_call(
        functools.partial(_ff_gate_kernel, bg=bg),
        out_shape=jax.ShapeDtypeStruct((N, D), jnp.float32),
        grid=(pl.cdiv(N, TN),),
        in_specs=[pl.BlockSpec((TN, D), lambda i: (i, 0)),
                  pl.BlockSpec((1, D), lambda i: (0, 0)),       # ln2_g
                  pl.BlockSpec((1, D), lambda i: (0, 0)),       # ln2_b
                  pl.BlockSpec((D, F), lambda i: (0, 0)),       # ff_w1
                  pl.BlockSpec((1, F), lambda i: (0, 0)),       # ff_b1
                  pl.BlockSpec((F, D), lambda i: (0, 0)),       # ff_w2
                  pl.BlockSpec((1, D), lambda i: (0, 0)),       # ff_b2
                  pl.BlockSpec((D, 3 * D), lambda i: (0, 0)),   # gate2 [Wr|Wz|Wg]
                  pl.BlockSpec((1, 3 * D), lambda i: (0, 0)),
                  pl.BlockSpec((D, 2 * D), lambda i: (0, 0)),   # gate2 [Ur|Uz]
                  pl.BlockSpec((1, 2 * D), lambda i: (0, 0)),
                  pl.BlockSpec((D, D), lambda i: (0, 0)),       # gate2 Ug
                  pl.BlockSpec((1, D), lambda i: (0, 0))],
        out_specs=pl.BlockSpec((TN, D), lambda i: (i, 0)),
        compiler_params=pltpu.CompilerParams(
            dimension_semantics=("parallel",),
            vmem_limit_bytes=32 * 1024 * 1024),
    )(x, p['ln2_g'], p['ln2_b'], p['ff_w1'], p['ff_b1'], p['ff_w2'], p['ff_b2'],
      p['g2_wy'], p['g2_by'], p['g2_wx'], p['g2_bx'], p['g2_wu'], p['g2_bu'])
    return out.reshape(B, T, D)


# ------------------------------- JAX glue ------------------------------------

def positional_embedding(positions, d_input):
    inv_freq = 1.0 / (10000.0 ** (jnp.arange(0.0, d_input, 2.0) / d_input))
    sinusoid = positions[:, None] * inv_freq[None, :]
    pe = jnp.concatenate([jnp.sin(sinusoid), jnp.cos(sinusoid)], axis=-1)
    if d_input % 2 != 0:
        pe = pe[:, :-1]
    return pe.astype(jnp.float32)                           # (S, d_input)


def stable_transformer_xl_forward(params, inputs, memory=None,
                                  src_key_padding_mask=None, *,
                                  n_heads, d_head_inner, mem_len=100):
    T, B, D = inputs.shape
    n_layers = len(params['layers'])
    if memory is None:
        memory = [jnp.zeros((0, B, D), jnp.float32) for _ in range(n_layers + 1)]
    assert len(memory) == n_layers + 1
    P = memory[0].shape[0]
    S = T + P

    # key-padding vector (memory keys are never padded); causal mask is built
    # in-kernel from iota, so only this thin (B,1,S) vector is passed.
    if src_key_padding_mask is not None:
        kpm = jnp.concatenate([jnp.zeros((B, P), bool),
                               src_key_padding_mask.astype(bool)], axis=1)
    else:
        kpm = jnp.zeros((B, S), bool)
    pad_b1s = kpm.astype(jnp.int32)[:, None, :]              # (B, 1, S)

    pos_ips = jnp.arange(S - 1, -1, -1.0, dtype=jnp.float32)
    pos_emb = positional_embedding(pos_ips, D)               # (S, D)

    # batch-major layout inside the layer stack (no per-stage transposes)
    x_btd = jnp.transpose(inputs, (1, 0, 2))                 # (B, T, D)
    mems_b = [jnp.transpose(m, (1, 0, 2)) if P > 0 else None for m in memory]

    hidden = [x_btd]
    layer_out = x_btd
    for mem_b, lp in zip(mems_b, params['layers']):
        attn_gated = attention_gate_layer(lp, params['u'], params['v'],
                                          layer_out, mem_b, pos_emb, pad_b1s,
                                          n_heads, d_head_inner)
        layer_out = ff_gate_block(lp, attn_gated)
        hidden.append(layer_out)

    # update_memory (stop_gradient == torch.no_grad + detach)
    end_idx = P + T
    beg_idx = max(0, end_idx - mem_len)
    new_memory = []
    for m_old, h_b in zip(memory, hidden):
        h_tbd = jnp.transpose(h_b, (1, 0, 2))
        cat = jnp.concatenate([m_old, h_tbd], axis=0)
        new_memory.append(jax.lax.stop_gradient(cat[beg_idx:end_idx]))

    logits = jnp.transpose(layer_out, (1, 0, 2))              # back to (T, B, D)
    return {'logits': logits, 'memory': new_memory}


# --------------------------- deterministic params ----------------------------

def init_params(key, d_input, n_layers, n_heads, d_head_inner, d_ff_inner):
    D, H, d, F = d_input, n_heads, d_head_inner, d_ff_inner
    keys = iter(jax.random.split(key, 256))

    def w(shape, scale=0.1):
        return (scale * jax.random.normal(next(keys), shape)).astype(jnp.float32)

    params = {'u': w((H, d), 0.05), 'v': w((H, d), 0.05), 'layers': []}
    for _ in range(n_layers):
        params['layers'].append({
            'ln1_g': jnp.ones((1, D), jnp.float32), 'ln1_b': jnp.zeros((1, D), jnp.float32),
            'ln2_g': jnp.ones((1, D), jnp.float32), 'ln2_b': jnp.zeros((1, D), jnp.float32),
            # projections stored as (in, out)  (== torch weight.T), bias-free
            'w_q': w((D, H * d)), 'w_kv': w((D, 2 * H * d)),
            'w_p': w((D, H * d)), 'w_out': w((H * d, D)),
            # gating weights packed: y-side [Wr|Wz|Wg], x-side [Ur|Uz], plus Ug
            'g1_wy': w((D, 3 * D)), 'g1_by': w((1, 3 * D), 0.01),
            'g1_wx': w((D, 2 * D)), 'g1_bx': w((1, 2 * D), 0.01),
            'g1_wu': w((D, D)), 'g1_bu': w((1, D), 0.01),
            'g2_wy': w((D, 3 * D)), 'g2_by': w((1, 3 * D), 0.01),
            'g2_wx': w((D, 2 * D)), 'g2_bx': w((1, 2 * D), 0.01),
            'g2_wu': w((D, D)), 'g2_bu': w((1, D), 0.01),
            'ff_w1': w((D, F)), 'ff_b1': w((1, F), 0.01),
            'ff_w2': w((F, D)), 'ff_b2': w((1, D), 0.01),
        })
    return params


# ---------------------------------- main --------------------------------------

if __name__ == "__main__":
    key = jax.random.PRNGKey(0)
    pkey, xkey = jax.random.split(key)

    T, B = 8, 2                     # seq, batch
    D = 32                          # d_input
    n_layers, H, d_head, d_ff = 2, 4, 8, 64

    params = init_params(pkey, D, n_layers, H, d_head, d_ff)
    inputs = jax.random.normal(xkey, (T, B, D), dtype=jnp.float32)

    out = stable_transformer_xl_forward(params, inputs, memory=None,
                                        src_key_padding_mask=None,
                                        n_heads=H, d_head_inner=d_head,
                                        mem_len=100)
    jax.block_until_ready(out['logits'])
    for m in out['memory']:
        jax.block_until_ready(m)

    assert out['logits'].shape == (T, B, D)
    assert len(out['memory']) == n_layers + 1
    assert out['memory'][0].shape == (min(100, T), B, D)
    print("KERNEL_OK")
</pallas_src>

<mosaic_0001>
module attributes {stable_mosaic.version = 11 : i64} {
  func.func @_attn_gate_kernel(%arg0: i32, %arg1: memref<1x8x32xf32, #tpu.memory_space<vmem>>, %arg2: memref<8x32xf32, #tpu.memory_space<vmem>>, %arg3: memref<1x1x8xi32, #tpu.memory_space<vmem>>, %arg4: memref<32x32xf32, #tpu.memory_space<vmem>>, %arg5: memref<32x64xf32, #tpu.memory_space<vmem>>, %arg6: memref<32x32xf32, #tpu.memory_space<vmem>>, %arg7: memref<32x32xf32, #tpu.memory_space<vmem>>, %arg8: memref<4x8xf32, #tpu.memory_space<vmem>>, %arg9: memref<4x8xf32, #tpu.memory_space<vmem>>, %arg10: memref<1x32xf32, #tpu.memory_space<vmem>>, %arg11: memref<1x32xf32, #tpu.memory_space<vmem>>, %arg12: memref<32x96xf32, #tpu.memory_space<vmem>>, %arg13: memref<1x96xf32, #tpu.memory_space<vmem>>, %arg14: memref<32x64xf32, #tpu.memory_space<vmem>>, %arg15: memref<1x64xf32, #tpu.memory_space<vmem>>, %arg16: memref<32x32xf32, #tpu.memory_space<vmem>>, %arg17: memref<1x32xf32, #tpu.memory_space<vmem>>, %arg18: memref<1x8x32xf32, #tpu.memory_space<vmem>>) attributes {dimension_semantics = [#tpu.dimension_semantics<parallel>], iteration_bounds = array<i64: 2>, scalar_prefetch = 0 : i64, scratch_operands = 0 : i64, tpu.core_type = #tpu.core_type<tc>, window_params = [{transform_indices = @transform_0, window_bounds = array<i64: 1, 8, 32>}, {pipeline_mode = #tpu.pipeline_mode<synchronous>, transform_indices = @transform_1, window_bounds = array<i64: 8, 32>}, {transform_indices = @transform_2, window_bounds = array<i64: 1, 1, 8>}, {pipeline_mode = #tpu.pipeline_mode<synchronous>, transform_indices = @transform_3, window_bounds = array<i64: 32, 32>}, {pipeline_mode = #tpu.pipeline_mode<synchronous>, transform_indices = @transform_4, window_bounds = array<i64: 32, 64>}, {pipeline_mode = #tpu.pipeline_mode<synchronous>, transform_indices = @transform_5, window_bounds = array<i64: 32, 32>}, {pipeline_mode = #tpu.pipeline_mode<synchronous>, transform_indices = @transform_6, window_bounds = array<i64: 32, 32>}, {pipeline_mode = #tpu.pipeline_mode<synchronous>, transform_indices = @transform_7, window_bounds = array<i64: 4, 8>}, {pipeline_mode = #tpu.pipeline_mode<synchronous>, transform_indices = @transform_8, window_bounds = array<i64: 4, 8>}, {pipeline_mode = #tpu.pipeline_mode<synchronous>, transform_indices = @transform_9, window_bounds = array<i64: 1, 32>}, {pipeline_mode = #tpu.pipeline_mode<synchronous>, transform_indices = @transform_10, window_bounds = array<i64: 1, 32>}, {pipeline_mode = #tpu.pipeline_mode<synchronous>, transform_indices = @transform_11, window_bounds = array<i64: 32, 96>}, {pipeline_mode = #tpu.pipeline_mode<synchronous>, transform_indices = @transform_12, window_bounds = array<i64: 1, 96>}, {pipeline_mode = #tpu.pipeline_mode<synchronous>, transform_indices = @transform_13, window_bounds = array<i64: 32, 64>}, {pipeline_mode = #tpu.pipeline_mode<synchronous>, transform_indices = @transform_14, window_bounds = array<i64: 1, 64>}, {pipeline_mode = #tpu.pipeline_mode<synchronous>, transform_indices = @transform_15, window_bounds = array<i64: 32, 32>}, {pipeline_mode = #tpu.pipeline_mode<synchronous>, transform_indices = @transform_16, window_bounds = array<i64: 1, 32>}, {transform_indices = @transform_17, window_bounds = array<i64: 1, 8, 32>}]} {
    %c0 = arith.constant 0 : index
    %c0_0 = arith.constant 0 : index
    %c0_1 = arith.constant 0 : index
    %0 = vector.load %arg1[%c0, %c0_0, %c0_1] : memref<1x8x32xf32, #tpu.memory_space<vmem>>, vector<1x8x32xf32>
    %1 = vector.shape_cast %0 : vector<1x8x32xf32> to vector<8x32xf32>
    %c0_2 = arith.constant 0 : index
    %c0_3 = arith.constant 0 : index
    %2 = vector.load %arg10[%c0_2, %c0_3] : memref<1x32xf32, #tpu.memory_space<vmem>>, vector<1x32xf32>
    %c0_4 = arith.constant 0 : index
    %c0_5 = arith.constant 0 : index
    %3 = vector.load %arg11[%c0_4, %c0_5] : memref<1x32xf32, #tpu.memory_space<vmem>>, vector<1x32xf32>
    %cst = arith.constant dense<0.000000e+00> : vector<8xf32>
    %4 = vector.multi_reduction <add>, %1, %cst [1] : vector<8x32xf32> to vector<8xf32>
    %5 = vector.shape_cast %4 : vector<8xf32> to vector<8x1xf32>
    %cst_6 = arith.constant 3.200000e+01 : f32
    %6 = vector.broadcast %cst_6 : f32 to vector<8x1xf32>
    %7 = arith.divf %5, %6 : vector<8x1xf32>
    %8 = vector.broadcast %7 : vector<8x1xf32> to vector<8x32xf32>
    %9 = arith.subf %1, %8 : vector<8x32xf32>
    %10 = arith.mulf %9, %9 : vector<8x32xf32>
    %cst_7 = arith.constant dense<0.000000e+00> : vector<8xf32>
    %11 = vector.multi_reduction <add>, %10, %cst_7 [1] : vector<8x32xf32> to vector<8xf32>
    %12 = vector.shape_cast %11 : vector<8xf32> to vector<8x1xf32>
    %cst_8 = arith.constant 3.200000e+01 : f32
    %13 = vector.broadcast %cst_8 : f32 to vector<8x1xf32>
    %14 = arith.divf %12, %13 : vector<8x1xf32>
    %cst_9 = arith.constant 9.99999974E-6 : f32
    %15 = vector.broadcast %cst_9 : f32 to vector<8x1xf32>
    %16 = arith.addf %14, %15 : vector<8x1xf32>
    %17 = math.rsqrt %16 : vector<8x1xf32>
    %18 = vector.broadcast %17 : vector<8x1xf32> to vector<8x32xf32>
    %19 = arith.mulf %9, %18 : vector<8x32xf32>
    %20 = vector.broadcast %2 : vector<1x32xf32> to vector<8x32xf32>
    %21 = arith.mulf %19, %20 : vector<8x32xf32>
    %22 = vector.broadcast %3 : vector<1x32xf32> to vector<8x32xf32>
    %23 = arith.addf %21, %22 : vector<8x32xf32>
    %c0_10 = arith.constant 0 : index
    %c0_11 = arith.constant 0 : index
    %24 = vector.load %arg4[%c0_10, %c0_11] : memref<32x32xf32, #tpu.memory_space<vmem>>, vector<32x32xf32>
    %cst_12 = arith.constant dense<0.000000e+00> : vector<8x32xf32>
    %25 = tpu.matmul %23, %24, %cst_12 {dimension_numbers = #tpu.dot_dimension_numbers<[1], [0], [0], [1], [0, 0, 1, 1], [], []>} : vector<8x32xf32>, vector<32x32xf32>, vector<8x32xf32> -> vector<8x32xf32>
    %c0_13 = arith.constant 0 : index
    %c0_14 = arith.constant 0 : index
    %26 = vector.load %arg5[%c0_13, %c0_14] : memref<32x64xf32, #tpu.memory_space<vmem>>, vector<32x64xf32>
    %cst_15 = arith.constant dense<0.000000e+00> : vector<8x64xf32>
    %27 = tpu.matmul %23, %26, %cst_15 {dimension_numbers = #tpu.dot_dimension_numbers<[1], [0], [0], [1], [0, 0, 1, 1], [], []>} : vector<8x32xf32>, vector<32x64xf32>, vector<8x64xf32> -> vector<8x64xf32>
    %c0_16 = arith.constant 0 : index
    %c0_17 = arith.constant 0 : index
    %28 = vector.load %arg2[%c0_16, %c0_17] : memref<8x32xf32, #tpu.memory_space<vmem>>, vector<8x32xf32>
    %c0_18 = arith.constant 0 : index
    %c0_19 = arith.constant 0 : index
    %29 = vector.load %arg6[%c0_18, %c0_19] : memref<32x32xf32, #tpu.memory_space<vmem>>, vector<32x32xf32>
    %cst_20 = arith.constant dense<0.000000e+00> : vector<8x32xf32>
    %30 = tpu.matmul %28, %29, %cst_20 {dimension_numbers = #tpu.dot_dimension_numbers<[1], [0], [0], [1], [0, 0, 1, 1], [], []>} : vector<8x32xf32>, vector<32x32xf32>, vector<8x32xf32> -> vector<8x32xf32>
    %c0_21 = arith.constant 0 : index
    %c0_22 = arith.constant 0 : index
    %31 = vector.load %arg8[%c0_21, %c0_22] : memref<4x8xf32, #tpu.memory_space<vmem>>, vector<4x8xf32>
    %c0_23 = arith.constant 0 : index
    %c0_24 = arith.constant 0 : index
    %32 = vector.load %arg9[%c0_23, %c0_24] : memref<4x8xf32, #tpu.memory_space<vmem>>, vector<4x8xf32>
    %c0_25 = arith.constant 0 : index
    %c0_26 = arith.constant 0 : index
    %33 = vector.load %arg7[%c0_25, %c0_26] : memref<32x32xf32, #tpu.memory_space<vmem>>, vector<32x32xf32>
    %34 = tpu.iota {dimensions = array<i32: 0>} : vector<8x8xi32>
    %35 = tpu.iota {dimensions = array<i32: 1>} : vector<8x8xi32>
    %c0_i32 = arith.constant 0 : i32
    %36 = vector.broadcast %c0_i32 : i32 to vector<8x8xi32>
    %37 = arith.addi %34, %36 : vector<8x8xi32>
    %38 = arith.cmpi sgt, %35, %37 : vector<8x8xi32>
    %c0_27 = arith.constant 0 : index
    %c0_28 = arith.constant 0 : index
    %c0_29 = arith.constant 0 : index
    %39 = vector.load %arg3[%c0_27, %c0_28, %c0_29] : memref<1x1x8xi32, #tpu.memory_space<vmem>>, vector<1x1x8xi32>
    %40 = vector.shape_cast %39 : vector<1x1x8xi32> to vector<1x8xi32>
    %c0_i32_30 = arith.constant 0 : i32
    %41 = vector.broadcast %c0_i32_30 : i32 to vector<1x8xi32>
    %42 = arith.cmpi sgt, %40, %41 : vector<1x8xi32>
    %43 = vector.broadcast %42 : vector<1x8xi1> to vector<8x8xi1>
    %44 = arith.ori %38, %43 : vector<8x8xi1>
    %cst_31 = arith.constant 0.000000e+00 : f32
    %45 = vector.broadcast %cst_31 : f32 to vector<8x32xf32>
    %46 = vector.extract_strided_slice %25 {offsets = [0, 0], sizes = [8, 8], strides = [1, 1]} : vector<8x32xf32> to vector<8x8xf32>
    %47 = vector.extract_strided_slice %27 {offsets = [0, 0], sizes = [8, 8], strides = [1, 1]} : vector<8x64xf32> to vector<8x8xf32>
    %48 = vector.extract_strided_slice %27 {offsets = [0, 32], sizes = [8, 8], strides = [1, 1]} : vector<8x64xf32> to vector<8x8xf32>
    %49 = vector.extract_strided_slice %30 {offsets = [0, 0], sizes = [8, 8], strides = [1, 1]} : vector<8x32xf32> to vector<8x8xf32>
    %50 = tpu.concatenate %47, %49 in 0 : vector<8x8xf32>, vector<8x8xf32> -> vector<16x8xf32>
    %cst_32 = arith.constant dense<0.000000e+00> : vector<8x16xf32>
    %51 = tpu.matmul %46, %50, %cst_32 {dimension_numbers = #tpu.dot_dimension_numbers<[1], [1], [0], [0], [0, 0, 1, 0], [], []>} : vector<8x8xf32>, vector<16x8xf32>, vector<8x16xf32> -> vector<8x16xf32>
    %52 = vector.extract_strided_slice %31 {offsets = [0, 0], sizes = [1, 8], strides = [1, 1]} : vector<4x8xf32> to vector<1x8xf32>
    %cst_33 = arith.constant dense<0.000000e+00> : vector<1x8xf32>
    %53 = tpu.matmul %52, %47, %cst_33 {dimension_numbers = #tpu.dot_dimension_numbers<[1], [1], [0], [0], [0, 0, 1, 0], [], []>} : vector<1x8xf32>, vector<8x8xf32>, vector<1x8xf32> -> vector<1x8xf32>
    %54 = vector.extract_strided_slice %32 {offsets = [0, 0], sizes = [1, 8], strides = [1, 1]} : vector<4x8xf32> to vector<1x8xf32>
    %cst_34 = arith.constant dense<0.000000e+00> : vector<1x8xf32>
    %55 = tpu.matmul %54, %49, %cst_34 {dimension_numbers = #tpu.dot_dimension_numbers<[1], [1], [0], [0], [0, 0, 1, 0], [], []>} : vector<1x8xf32>, vector<8x8xf32>, vector<1x8xf32> -> vector<1x8xf32>
    %56 = vector.extract_strided_slice %51 {offsets = [0, 0], sizes = [8, 8], strides = [1, 1]} : vector<8x16xf32> to vector<8x8xf32>
    %57 = vector.broadcast %53 : vector<1x8xf32> to vector<8x8xf32>
    %58 = arith.addf %56, %57 : vector<8x8xf32>
    %59 = vector.extract_strided_slice %51 {offsets = [0, 8], sizes = [8, 8], strides = [1, 1]} : vector<8x16xf32> to vector<8x8xf32>
    %60 = vector.broadcast %55 : vector<1x8xf32> to vector<8x8xf32>
    %61 = arith.addf %59, %60 : vector<8x8xf32>
    %cst_35 = arith.constant 0.000000e+00 : f32
    %62 = vector.broadcast %cst_35 : f32 to vector<8x8xf32>
    %c7_i32 = arith.constant 7 : i32
    %63 = vector.broadcast %c7_i32 : i32 to vector<8x8xi32>
    %64 = arith.cmpi eq, %34, %63 : vector<8x8xi32>
    %65 = arith.select %64, %61, %62 : vector<8x8xi1>, vector<8x8xf32>
    %66 = vector.extract_strided_slice %61 {offsets = [0, 1], sizes = [8, 7], strides = [1, 1]} : vector<8x8xf32> to vector<8x7xf32>
    %cst_36 = arith.constant 0.000000e+00 : f32
    %67 = vector.broadcast %cst_36 : f32 to vector<8x1xf32>
    %68 = tpu.concatenate %66, %67 in 1 : vector<8x7xf32>, vector<8x1xf32> -> vector<8x8xf32>
    %c6_i32 = arith.constant 6 : i32
    %69 = vector.broadcast %c6_i32 : i32 to vector<8x8xi32>
    %70 = arith.cmpi eq, %34, %69 : vector<8x8xi32>
    %71 = arith.select %70, %68, %65 : vector<8x8xi1>, vector<8x8xf32>
    %72 = vector.extract_strided_slice %61 {offsets = [0, 2], sizes = [8, 6], strides = [1, 1]} : vector<8x8xf32> to vector<8x6xf32>
    %cst_37 = arith.constant 0.000000e+00 : f32
    %73 = vector.broadcast %cst_37 : f32 to vector<8x2xf32>
    %74 = tpu.concatenate %72, %73 in 1 : vector<8x6xf32>, vector<8x2xf32> -> vector<8x8xf32>
    %c5_i32 = arith.constant 5 : i32
    %75 = vector.broadcast %c5_i32 : i32 to vector<8x8xi32>
    %76 = arith.cmpi eq, %34, %75 : vector<8x8xi32>
    %77 = arith.select %76, %74, %71 : vector<8x8xi1>, vector<8x8xf32>
    %78 = vector.extract_strided_slice %61 {offsets = [0, 3], sizes = [8, 5], strides = [1, 1]} : vector<8x8xf32> to vector<8x5xf32>
    %cst_38 = arith.constant 0.000000e+00 : f32
    %79 = vector.broadcast %cst_38 : f32 to vector<8x3xf32>
    %80 = tpu.concatenate %78, %79 in 1 : vector<8x5xf32>, vector<8x3xf32> -> vector<8x8xf32>
    %c4_i32 = arith.constant 4 : i32
    %81 = vector.broadcast %c4_i32 : i32 to vector<8x8xi32>
    %82 = arith.cmpi eq, %34, %81 : vector<8x8xi32>
    %83 = arith.select %82, %80, %77 : vector<8x8xi1>, vector<8x8xf32>
    %84 = vector.extract_strided_slice %61 {offsets = [0, 4], sizes = [8, 4], strides = [1, 1]} : vector<8x8xf32> to vector<8x4xf32>
    %cst_39 = arith.constant 0.000000e+00 : f32
    %85 = vector.broadcast %cst_39 : f32 to vector<8x4xf32>
    %86 = tpu.concatenate %84, %85 in 1 : vector<8x4xf32>, vector<8x4xf32> -> vector<8x8xf32>
    %c3_i32 = arith.constant 3 : i32
    %87 = vector.broadcast %c3_i32 : i32 to vector<8x8xi32>
    %88 = arith.cmpi eq, %34, %87 : vector<8x8xi32>
    %89 = arith.select %88, %86, %83 : vector<8x8xi1>, vector<8x8xf32>
    %90 = vector.extract_strided_slice %61 {offsets = [0, 5], sizes = [8, 3], strides = [1, 1]} : vector<8x8xf32> to vector<8x3xf32>
    %cst_40 = arith.constant 0.000000e+00 : f32
    %91 = vector.broadcast %cst_40 : f32 to vector<8x5xf32>
    %92 = tpu.concatenate %90, %91 in 1 : vector<8x3xf32>, vector<8x5xf32> -> vector<8x8xf32>
    %c2_i32 = arith.constant 2 : i32
    %93 = vector.broadcast %c2_i32 : i32 to vector<8x8xi32>
    %94 = arith.cmpi eq, %34, %93 : vector<8x8xi32>
    %95 = arith.select %94, %92, %89 : vector<8x8xi1>, vector<8x8xf32>
    %96 = vector.extract_strided_slice %61 {offsets = [0, 6], sizes = [8, 2], strides = [1, 1]} : vector<8x8xf32> to vector<8x2xf32>
    %cst_41 = arith.constant 0.000000e+00 : f32
    %97 = vector.broadcast %cst_41 : f32 to vector<8x6xf32>
    %98 = tpu.concatenate %96, %97 in 1 : vector<8x2xf32>, vector<8x6xf32> -> vector<8x8xf32>
    %c1_i32 = arith.constant 1 : i32
    %99 = vector.broadcast %c1_i32 : i32 to vector<8x8xi32>
    %100 = arith.cmpi eq, %34, %99 : vector<8x8xi32>
    %101 = arith.select %100, %98, %95 : vector<8x8xi1>, vector<8x8xf32>
    %102 = vector.extract_strided_slice %61 {offsets = [0, 7], sizes = [8, 1], strides = [1, 1]} : vector<8x8xf32> to vector<8x1xf32>
    %cst_42 = arith.constant 0.000000e+00 : f32
    %103 = vector.broadcast %cst_42 : f32 to vector<8x7xf32>
    %104 = tpu.concatenate %102, %103 in 1 : vector<8x1xf32>, vector<8x7xf32> -> vector<8x8xf32>
    %c0_i32_43 = arith.constant 0 : i32
    %105 = vector.broadcast %c0_i32_43 : i32 to vector<8x8xi32>
    %106 = arith.cmpi eq, %34, %105 : vector<8x8xi32>
    %107 = arith.select %106, %104, %101 : vector<8x8xi1>, vector<8x8xf32>
    %108 = arith.addf %58, %107 : vector<8x8xf32>
    %cst_44 = arith.constant 0xFF800000 : f32
    %109 = vector.broadcast %cst_44 : f32 to vector<8x8xf32>
    %110 = arith.select %44, %109, %108 : vector<8x8xi1>, vector<8x8xf32>
    %cst_45 = arith.constant 0.353553385 : f32
    %111 = vector.broadcast %cst_45 : f32 to vector<8x8xf32>
    %112 = arith.mulf %110, %111 : vector<8x8xf32>
    %cst_46 = arith.constant dense<0xFF800000> : vector<8xf32>
    %113 = vector.multi_reduction <maximumf>, %112, %cst_46 [1] : vector<8x8xf32> to vector<8xf32>
    %114 = vector.shape_cast %113 : vector<8xf32> to vector<8x1xf32>
    %115 = vector.broadcast %114 : vector<8x1xf32> to vector<8x8xf32>
    %116 = arith.subf %112, %115 : vector<8x8xf32>
    %117 = math.exp %116 : vector<8x8xf32>
    %cst_47 = arith.constant dense<0.000000e+00> : vector<8xf32>
    %118 = vector.multi_reduction <add>, %117, %cst_47 [1] : vector<8x8xf32> to vector<8xf32>
    %119 = vector.shape_cast %118 : vector<8xf32> to vector<8x1xf32>
    %120 = tpu.reciprocal %119 {approx = true} : vector<8x1xf32> -> vector<8x1xf32>
    %121 = vector.broadcast %120 : vector<8x1xf32> to vector<8x8xf32>
    %122 = arith.mulf %117, %121 : vector<8x8xf32>
    %cst_48 = arith.constant dense<0.000000e+00> : vector<8x8xf32>
    %123 = tpu.matmul %122, %48, %cst_48 {dimension_numbers = #tpu.dot_dimension_numbers<[1], [0], [0], [1], [0, 0, 1, 1], [], []>} : vector<8x8xf32>, vector<8x8xf32>, vector<8x8xf32> -> vector<8x8xf32>
    %124 = vector.extract_strided_slice %33 {offsets = [0, 0], sizes = [8, 32], strides = [1, 1]} : vector<32x32xf32> to vector<8x32xf32>
    %cst_49 = arith.constant dense<0.000000e+00> : vector<8x32xf32>
    %125 = tpu.matmul %123, %124, %cst_49 {dimension_numbers = #tpu.dot_dimension_numbers<[1], [0], [0], [1], [0, 0, 1, 1], [], []>} : vector<8x8xf32>, vector<8x32xf32>, vector<8x32xf32> -> vector<8x32xf32>
    %126 = arith.addf %45, %125 : vector<8x32xf32>
    %127 = vector.extract_strided_slice %25 {offsets = [0, 8], sizes = [8, 8], strides = [1, 1]} : vector<8x32xf32> to vector<8x8xf32>
    %128 = vector.extract_strided_slice %27 {offsets = [0, 8], sizes = [8, 8], strides = [1, 1]} : vector<8x64xf32> to vector<8x8xf32>
    %129 = vector.extract_strided_slice %27 {offsets = [0, 40], sizes = [8, 8], strides = [1, 1]} : vector<8x64xf32> to vector<8x8xf32>
    %130 = vector.extract_strided_slice %30 {offsets = [0, 8], sizes = [8, 8], strides = [1, 1]} : vector<8x32xf32> to vector<8x8xf32>
    %131 = tpu.concatenate %128, %130 in 0 : vector<8x8xf32>, vector<8x8xf32> -> vector<16x8xf32>
    %cst_50 = arith.constant dense<0.000000e+00> : vector<8x16xf32>
    %132 = tpu.matmul %127, %131, %cst_50 {dimension_numbers = #tpu.dot_dimension_numbers<[1], [1], [0], [0], [0, 0, 1, 0], [], []>} : vector<8x8xf32>, vector<16x8xf32>, vector<8x16xf32> -> vector<8x16xf32>
    %133 = vector.extract_strided_slice %31 {offsets = [1, 0], sizes = [1, 8], strides = [1, 1]} : vector<4x8xf32> to vector<1x8xf32>
    %cst_51 = arith.constant dense<0.000000e+00> : vector<1x8xf32>
    %134 = tpu.matmul %133, %128, %cst_51 {dimension_numbers = #tpu.dot_dimension_numbers<[1], [1], [0], [0], [0, 0, 1, 0], [], []>} : vector<1x8xf32>, vector<8x8xf32>, vector<1x8xf32> -> vector<1x8xf32>
    %135 = vector.extract_strided_slice %32 {offsets = [1, 0], sizes = [1, 8], strides = [1, 1]} : vector<4x8xf32> to vector<1x8xf32>
    %cst_52 = arith.constant dense<0.000000e+00> : vector<1x8xf32>
    %136 = tpu.matmul %135, %130, %cst_52 {dimension_numbers = #tpu.dot_dimension_numbers<[1], [1], [0], [0], [0, 0, 1, 0], [], []>} : vector<1x8xf32>, vector<8x8xf32>, vector<1x8xf32> -> vector<1x8xf32>
    %137 = vector.extract_strided_slice %132 {offsets = [0, 0], sizes = [8, 8], strides = [1, 1]} : vector<8x16xf32> to vector<8x8xf32>
    %138 = vector.broadcast %134 : vector<1x8xf32> to vector<8x8xf32>
    %139 = arith.addf %137, %138 : vector<8x8xf32>
    %140 = vector.extract_strided_slice %132 {offsets = [0, 8], sizes = [8, 8], strides = [1, 1]} : vector<8x16xf32> to vector<8x8xf32>
    %141 = vector.broadcast %136 : vector<1x8xf32> to vector<8x8xf32>
    %142 = arith.addf %140, %141 : vector<8x8xf32>
    %cst_53 = arith.constant 0.000000e+00 : f32
    %143 = vector.broadcast %cst_53 : f32 to vector<8x8xf32>
    %c7_i32_54 = arith.constant 7 : i32
    %144 = vector.broadcast %c7_i32_54 : i32 to vector<8x8xi32>
    %145 = arith.cmpi eq, %34, %144 : vector<8x8xi32>
    %146 = arith.select %145, %142, %143 : vector<8x8xi1>, vector<8x8xf32>
    %147 = vector.extract_strided_slice %142 {offsets = [0, 1], sizes = [8, 7], strides = [1, 1]} : vector<8x8xf32> to vector<8x7xf32>
    %cst_55 = arith.constant 0.000000e+00 : f32
    %148 = vector.broadcast %cst_55 : f32 to vector<8x1xf32>
    %149 = tpu.concatenate %147, %148 in 1 : vector<8x7xf32>, vector<8x1xf32> -> vector<8x8xf32>
    %c6_i32_56 = arith.constant 6 : i32
    %150 = vector.broadcast %c6_i32_56 : i32 to vector<8x8xi32>
    %151 = arith.cmpi eq, %34, %150 : vector<8x8xi32>
    %152 = arith.select %151, %149, %146 : vector<8x8xi1>, vector<8x8xf32>
    %153 = vector.extract_strided_slice %142 {offsets = [0, 2], sizes = [8, 6], strides = [1, 1]} : vector<8x8xf32> to vector<8x6xf32>
    %cst_57 = arith.constant 0.000000e+00 : f32
    %154 = vector.broadcast %cst_57 : f32 to vector<8x2xf32>
    %155 = tpu.concatenate %153, %154 in 1 : vector<8x6xf32>, vector<8x2xf32> -> vector<8x8xf32>
    %c5_i32_58 = arith.constant 5 : i32
    %156 = vector.broadcast %c5_i32_58 : i32 to vector<8x8xi32>
    %157 = arith.cmpi eq, %34, %156 : vector<8x8xi32>
    %158 = arith.select %157, %155, %152 : vector<8x8xi1>, vector<8x8xf32>
    %159 = vector.extract_strided_slice %142 {offsets = [0, 3], sizes = [8, 5], strides = [1, 1]} : vector<8x8xf32> to vector<8x5xf32>
    %cst_59 = arith.constant 0.000000e+00 : f32
    %160 = vector.broadcast %cst_59 : f32 to vector<8x3xf32>
    %161 = tpu.concatenate %159, %160 in 1 : vector<8x5xf32>, vector<8x3xf32> -> vector<8x8xf32>
    %c4_i32_60 = arith.constant 4 : i32
    %162 = vector.broadcast %c4_i32_60 : i32 to vector<8x8xi32>
    %163 = arith.cmpi eq, %34, %162 : vector<8x8xi32>
    %164 = arith.select %163, %161, %158 : vector<8x8xi1>, vector<8x8xf32>
    %165 = vector.extract_strided_slice %142 {offsets = [0, 4], sizes = [8, 4], strides = [1, 1]} : vector<8x8xf32> to vector<8x4xf32>
    %cst_61 = arith.constant 0.000000e+00 : f32
    %166 = vector.broadcast %cst_61 : f32 to vector<8x4xf32>
    %167 = tpu.concatenate %165, %166 in 1 : vector<8x4xf32>, vector<8x4xf32> -> vector<8x8xf32>
    %c3_i32_62 = arith.constant 3 : i32
    %168 = vector.broadcast %c3_i32_62 : i32 to vector<8x8xi32>
    %169 = arith.cmpi eq, %34, %168 : vector<8x8xi32>
    %170 = arith.select %169, %167, %164 : vector<8x8xi1>, vector<8x8xf32>
    %171 = vector.extract_strided_slice %142 {offsets = [0, 5], sizes = [8, 3], strides = [1, 1]} : vector<8x8xf32> to vector<8x3xf32>
    %cst_63 = arith.constant 0.000000e+00 : f32
    %172 = vector.broadcast %cst_63 : f32 to vector<8x5xf32>
    %173 = tpu.concatenate %171, %172 in 1 : vector<8x3xf32>, vector<8x5xf32> -> vector<8x8xf32>
    %c2_i32_64 = arith.constant 2 : i32
    %174 = vector.broadcast %c2_i32_64 : i32 to vector<8x8xi32>
    %175 = arith.cmpi eq, %34, %174 : vector<8x8xi32>
    %176 = arith.select %175, %173, %170 : vector<8x8xi1>, vector<8x8xf32>
    %177 = vector.extract_strided_slice %142 {offsets = [0, 6], sizes = [8, 2], strides = [1, 1]} : vector<8x8xf32> to vector<8x2xf32>
    %cst_65 = arith.constant 0.000000e+00 : f32
    %178 = vector.broadcast %cst_65 : f32 to vector<8x6xf32>
    %179 = tpu.concatenate %177, %178 in 1 : vector<8x2xf32>, vector<8x6xf32> -> vector<8x8xf32>
    %c1_i32_66 = arith.constant 1 : i32
    %180 = vector.broadcast %c1_i32_66 : i32 to vector<8x8xi32>
    %181 = arith.cmpi eq, %34, %180 : vector<8x8xi32>
    %182 = arith.select %181, %179, %176 : vector<8x8xi1>, vector<8x8xf32>
    %183 = vector.extract_strided_slice %142 {offsets = [0, 7], sizes = [8, 1], strides = [1, 1]} : vector<8x8xf32> to vector<8x1xf32>
    %cst_67 = arith.constant 0.000000e+00 : f32
    %184 = vector.broadcast %cst_67 : f32 to vector<8x7xf32>
    %185 = tpu.concatenate %183, %184 in 1 : vector<8x1xf32>, vector<8x7xf32> -> vector<8x8xf32>
    %c0_i32_68 = arith.constant 0 : i32
    %186 = vector.broadcast %c0_i32_68 : i32 to vector<8x8xi32>
    %187 = arith.cmpi eq, %34, %186 : vector<8x8xi32>
    %188 = arith.select %187, %185, %182 : vector<8x8xi1>, vector<8x8xf32>
    %189 = arith.addf %139, %188 : vector<8x8xf32>
    %cst_69 = arith.constant 0xFF800000 : f32
    %190 = vector.broadcast %cst_69 : f32 to vector<8x8xf32>
    %191 = arith.select %44, %190, %189 : vector<8x8xi1>, vector<8x8xf32>
    %cst_70 = arith.constant 0.353553385 : f32
    %192 = vector.broadcast %cst_70 : f32 to vector<8x8xf32>
    %193 = arith.mulf %191, %192 : vector<8x8xf32>
    %cst_71 = arith.constant dense<0xFF800000> : vector<8xf32>
    %194 = vector.multi_reduction <maximumf>, %193, %cst_71 [1] : vector<8x8xf32> to vector<8xf32>
    %195 = vector.shape_cast %194 : vector<8xf32> to vector<8x1xf32>
    %196 = vector.broadcast %195 : vector<8x1xf32> to vector<8x8xf32>
    %197 = arith.subf %193, %196 : vector<8x8xf32>
    %198 = math.exp %197 : vector<8x8xf32>
    %cst_72 = arith.constant dense<0.000000e+00> : vector<8xf32>
    %199 = vector.multi_reduction <add>, %198, %cst_72 [1] : vector<8x8xf32> to vector<8xf32>
    %200 = vector.shape_cast %199 : vector<8xf32> to vector<8x1xf32>
    %201 = tpu.reciprocal %200 {approx = true} : vector<8x1xf32> -> vector<8x1xf32>
    %202 = vector.broadcast %201 : vector<8x1xf32> to vector<8x8xf32>
    %203 = arith.mulf %198, %202 : vector<8x8xf32>
    %cst_73 = arith.constant dense<0.000000e+00> : vector<8x8xf32>
    %204 = tpu.matmul %203, %129, %cst_73 {dimension_numbers = #tpu.dot_dimension_numbers<[1], [0], [0], [1], [0, 0, 1, 1], [], []>} : vector<8x8xf32>, vector<8x8xf32>, vector<8x8xf32> -> vector<8x8xf32>
    %205 = vector.extract_strided_slice %33 {offsets = [8, 0], sizes = [8, 32], strides = [1, 1]} : vector<32x32xf32> to vector<8x32xf32>
    %cst_74 = arith.constant dense<0.000000e+00> : vector<8x32xf32>
    %206 = tpu.matmul %204, %205, %cst_74 {dimension_numbers = #tpu.dot_dimension_numbers<[1], [0], [0], [1], [0, 0, 1, 1], [], []>} : vector<8x8xf32>, vector<8x32xf32>, vector<8x32xf32> -> vector<8x32xf32>
    %207 = arith.addf %126, %206 : vector<8x32xf32>
    %208 = vector.extract_strided_slice %25 {offsets = [0, 16], sizes = [8, 8], strides = [1, 1]} : vector<8x32xf32> to vector<8x8xf32>
    %209 = vector.extract_strided_slice %27 {offsets = [0, 16], sizes = [8, 8], strides = [1, 1]} : vector<8x64xf32> to vector<8x8xf32>
    %210 = vector.extract_strided_slice %27 {offsets = [0, 48], sizes = [8, 8], strides = [1, 1]} : vector<8x64xf32> to vector<8x8xf32>
    %211 = vector.extract_strided_slice %30 {offsets = [0, 16], sizes = [8, 8], strides = [1, 1]} : vector<8x32xf32> to vector<8x8xf32>
    %212 = tpu.concatenate %209, %211 in 0 : vector<8x8xf32>, vector<8x8xf32> -> vector<16x8xf32>
    %cst_75 = arith.constant dense<0.000000e+00> : vector<8x16xf32>
    %213 = tpu.matmul %208, %212, %cst_75 {dimension_numbers = #tpu.dot_dimension_numbers<[1], [1], [0], [0], [0, 0, 1, 0], [], []>} : vector<8x8xf32>, vector<16x8xf32>, vector<8x16xf32> -> vector<8x16xf32>
    %214 = vector.extract_strided_slice %31 {offsets = [2, 0], sizes = [1, 8], strides = [1, 1]} : vector<4x8xf32> to vector<1x8xf32>
    %cst_76 = arith.constant dense<0.000000e+00> : vector<1x8xf32>
    %215 = tpu.matmul %214, %209, %cst_76 {dimension_numbers = #tpu.dot_dimension_numbers<[1], [1], [0], [0], [0, 0, 1, 0], [], []>} : vector<1x8xf32>, vector<8x8xf32>, vector<1x8xf32> -> vector<1x8xf32>
    %216 = vector.extract_strided_slice %32 {offsets = [2, 0], sizes = [1, 8], strides = [1, 1]} : vector<4x8xf32> to vector<1x8xf32>
    %cst_77 = arith.constant dense<0.000000e+00> : vector<1x8xf32>
    %217 = tpu.matmul %216, %211, %cst_77 {dimension_numbers = #tpu.dot_dimension_numbers<[1], [1], [0], [0], [0, 0, 1, 0], [], []>} : vector<1x8xf32>, vector<8x8xf32>, vector<1x8xf32> -> vector<1x8xf32>
    %218 = vector.extract_strided_slice %213 {offsets = [0, 0], sizes = [8, 8], strides = [1, 1]} : vector<8x16xf32> to vector<8x8xf32>
    %219 = vector.broadcast %215 : vector<1x8xf32> to vector<8x8xf32>
    %220 = arith.addf %218, %219 : vector<8x8xf32>
    %221 = vector.extract_strided_slice %213 {offsets = [0, 8], sizes = [8, 8], strides = [1, 1]} : vector<8x16xf32> to vector<8x8xf32>
    %222 = vector.broadcast %217 : vector<1x8xf32> to vector<8x8xf32>
    %223 = arith.addf %221, %222 : vector<8x8xf32>
    %cst_78 = arith.constant 0.000000e+00 : f32
    %224 = vector.broadcast %cst_78 : f32 to vector<8x8xf32>
    %c7_i32_79 = arith.constant 7 : i32
    %225 = vector.broadcast %c7_i32_79 : i32 to vector<8x8xi32>
    %226 = arith.cmpi eq, %34, %225 : vector<8x8xi32>
    %227 = arith.select %226, %223, %224 : vector<8x8xi1>, vector<8x8xf32>
    %228 = vector.extract_strided_slice %223 {offsets = [0, 1], sizes = [8, 7], strides = [1, 1]} : vector<8x8xf32> to vector<8x7xf32>
    %cst_80 = arith.constant 0.000000e+00 : f32
    %229 = vector.broadcast %cst_80 : f32 to vector<8x1xf32>
    %230 = tpu.concatenate %228, %229 in 1 : vector<8x7xf32>, vector<8x1xf32> -> vector<8x8xf32>
    %c6_i32_81 = arith.constant 6 : i32
    %231 = vector.broadcast %c6_i32_81 : i32 to vector<8x8xi32>
    %232 = arith.cmpi eq, %34, %231 : vector<8x8xi32>
    %233 = arith.select %232, %230, %227 : vector<8x8xi1>, vector<8x8xf32>
    %234 = vector.extract_strided_slice %223 {offsets = [0, 2], sizes = [8, 6], strides = [1, 1]} : vector<8x8xf32> to vector<8x6xf32>
    %cst_82 = arith.constant 0.000000e+00 : f32
    %235 = vector.broadcast %cst_82 : f32 to vector<8x2xf32>
    %236 = tpu.concatenate %234, %235 in 1 : vector<8x6xf32>, vector<8x2xf32> -> vector<8x8xf32>
    %c5_i32_83 = arith.constant 5 : i32
    %237 = vector.broadcast %c5_i32_83 : i32 to vector<8x8xi32>
    %238 = arith.cmpi eq, %34, %237 : vector<8x8xi32>
    %239 = arith.select %238, %236, %233 : vector<8x8xi1>, vector<8x8xf32>
    %240 = vector.extract_strided_slice %223 {offsets = [0, 3], sizes = [8, 5], strides = [1, 1]} : vector<8x8xf32> to vector<8x5xf32>
    %cst_84 = arith.constant 0.000000e+00 : f32
    %241 = vector.broadcast %cst_84 : f32 to vector<8x3xf32>
    %242 = tpu.concatenate %240, %241 in 1 : vector<8x5xf32>, vector<8x3xf32> -> vector<8x8xf32>
    %c4_i32_85 = arith.constant 4 : i32
    %243 = vector.broadcast %c4_i32_85 : i32 to vector<8x8xi32>
    %244 = arith.cmpi eq, %34, %243 : vector<8x8xi32>
    %245 = arith.select %244, %242, %239 : vector<8x8xi1>, vector<8x8xf32>
    %246 = vector.extract_strided_slice %223 {offsets = [0, 4], sizes = [8, 4], strides = [1, 1]} : vector<8x8xf32> to vector<8x4xf32>
    %cst_86 = arith.constant 0.000000e+00 : f32
    %247 = vector.broadcast %cst_86 : f32 to vector<8x4xf32>
    %248 = tpu.concatenate %246, %247 in 1 : vector<8x4xf32>, vector<8x4xf32> -> vector<8x8xf32>
    %c3_i32_87 = arith.constant 3 : i32
    %249 = vector.broadcast %c3_i32_87 : i32 to vector<8x8xi32>
    %250 = arith.cmpi eq, %34, %249 : vector<8x8xi32>
    %251 = arith.select %250, %248, %245 : vector<8x8xi1>, vector<8x8xf32>
    %252 = vector.extract_strided_slice %223 {offsets = [0, 5], sizes = [8, 3], strides = [1, 1]} : vector<8x8xf32> to vector<8x3xf32>
    %cst_88 = arith.constant 0.000000e+00 : f32
    %253 = vector.broadcast %cst_88 : f32 to vector<8x5xf32>
    %254 = tpu.concatenate %252, %253 in 1 : vector<8x3xf32>, vector<8x5xf32> -> vector<8x8xf32>
    %c2_i32_89 = arith.constant 2 : i32
    %255 = vector.broadcast %c2_i32_89 : i32 to vector<8x8xi32>
    %256 = arith.cmpi eq, %34, %255 : vector<8x8xi32>
    %257 = arith.select %256, %254, %251 : vector<8x8xi1>, vector<8x8xf32>
    %258 = vector.extract_strided_slice %223 {offsets = [0, 6], sizes = [8, 2], strides = [1, 1]} : vector<8x8xf32> to vector<8x2xf32>
    %cst_90 = arith.constant 0.000000e+00 : f32
    %259 = vector.broadcast %cst_90 : f32 to vector<8x6xf32>
    %260 = tpu.concatenate %258, %259 in 1 : vector<8x2xf32>, vector<8x6xf32> -> vector<8x8xf32>
    %c1_i32_91 = arith.constant 1 : i32
    %261 = vector.broadcast %c1_i32_91 : i32 to vector<8x8xi32>
    %262 = arith.cmpi eq, %34, %261 : vector<8x8xi32>
    %263 = arith.select %262, %260, %257 : vector<8x8xi1>, vector<8x8xf32>
    %264 = vector.extract_strided_slice %223 {offsets = [0, 7], sizes = [8, 1], strides = [1, 1]} : vector<8x8xf32> to vector<8x1xf32>
    %cst_92 = arith.constant 0.000000e+00 : f32
    %265 = vector.broadcast %cst_92 : f32 to vector<8x7xf32>
    %266 = tpu.concatenate %264, %265 in 1 : vector<8x1xf32>, vector<8x7xf32> -> vector<8x8xf32>
    %c0_i32_93 = arith.constant 0 : i32
    %267 = vector.broadcast %c0_i32_93 : i32 to vector<8x8xi32>
    %268 = arith.cmpi eq, %34, %267 : vector<8x8xi32>
    %269 = arith.select %268, %266, %263 : vector<8x8xi1>, vector<8x8xf32>
    %270 = arith.addf %220, %269 : vector<8x8xf32>
    %cst_94 = arith.constant 0xFF800000 : f32
    %271 = vector.broadcast %cst_94 : f32 to vector<8x8xf32>
    %272 = arith.select %44, %271, %270 : vector<8x8xi1>, vector<8x8xf32>
    %cst_95 = arith.constant 0.353553385 : f32
    %273 = vector.broadcast %cst_95 : f32 to vector<8x8xf32>
    %274 = arith.mulf %272, %273 : vector<8x8xf32>
    %cst_96 = arith.constant dense<0xFF800000> : vector<8xf32>
    %275 = vector.multi_reduction <maximumf>, %274, %cst_96 [1] : vector<8x8xf32> to vector<8xf32>
    %276 = vector.shape_cast %275 : vector<8xf32> to vector<8x1xf32>
    %277 = vector.broadcast %276 : vector<8x1xf32> to vector<8x8xf32>
    %278 = arith.subf %274, %277 : vector<8x8xf32>
    %279 = math.exp %278 : vector<8x8xf32>
    %cst_97 = arith.constant dense<0.000000e+00> : vector<8xf32>
    %280 = vector.multi_reduction <add>, %279, %cst_97 [1] : vector<8x8xf32> to vector<8xf32>
    %281 = vector.shape_cast %280 : vector<8xf32> to vector<8x1xf32>
    %282 = tpu.reciprocal %281 {approx = true} : vector<8x1xf32> -> vector<8x1xf32>
    %283 = vector.broadcast %282 : vector<8x1xf32> to vector<8x8xf32>
    %284 = arith.mulf %279, %283 : vector<8x8xf32>
    %cst_98 = arith.constant dense<0.000000e+00> : vector<8x8xf32>
    %285 = tpu.matmul %284, %210, %cst_98 {dimension_numbers = #tpu.dot_dimension_numbers<[1], [0], [0], [1], [0, 0, 1, 1], [], []>} : vector<8x8xf32>, vector<8x8xf32>, vector<8x8xf32> -> vector<8x8xf32>
    %286 = vector.extract_strided_slice %33 {offsets = [16, 0], sizes = [8, 32], strides = [1, 1]} : vector<32x32xf32> to vector<8x32xf32>
    %cst_99 = arith.constant dense<0.000000e+00> : vector<8x32xf32>
    %287 = tpu.matmul %285, %286, %cst_99 {dimension_numbers = #tpu.dot_dimension_numbers<[1], [0], [0], [1], [0, 0, 1, 1], [], []>} : vector<8x8xf32>, vector<8x32xf32>, vector<8x32xf32> -> vector<8x32xf32>
    %288 = arith.addf %207, %287 : vector<8x32xf32>
    %289 = vector.extract_strided_slice %25 {offsets = [0, 24], sizes = [8, 8], strides = [1, 1]} : vector<8x32xf32> to vector<8x8xf32>
    %290 = vector.extract_strided_slice %27 {offsets = [0, 24], sizes = [8, 8], strides = [1, 1]} : vector<8x64xf32> to vector<8x8xf32>
    %291 = vector.extract_strided_slice %27 {offsets = [0, 56], sizes = [8, 8], strides = [1, 1]} : vector<8x64xf32> to vector<8x8xf32>
    %292 = vector.extract_strided_slice %30 {offsets = [0, 24], sizes = [8, 8], strides = [1, 1]} : vector<8x32xf32> to vector<8x8xf32>
    %293 = tpu.concatenate %290, %292 in 0 : vector<8x8xf32>, vector<8x8xf32> -> vector<16x8xf32>
    %cst_100 = arith.constant dense<0.000000e+00> : vector<8x16xf32>
    %294 = tpu.matmul %289, %293, %cst_100 {dimension_numbers = #tpu.dot_dimension_numbers<[1], [1], [0], [0], [0, 0, 1, 0], [], []>} : vector<8x8xf32>, vector<16x8xf32>, vector<8x16xf32> -> vector<8x16xf32>
    %295 = vector.extract_strided_slice %31 {offsets = [3, 0], sizes = [1, 8], strides = [1, 1]} : vector<4x8xf32> to vector<1x8xf32>
    %cst_101 = arith.constant dense<0.000000e+00> : vector<1x8xf32>
    %296 = tpu.matmul %295, %290, %cst_101 {dimension_numbers = #tpu.dot_dimension_numbers<[1], [1], [0], [0], [0, 0, 1, 0], [], []>} : vector<1x8xf32>, vector<8x8xf32>, vector<1x8xf32> -> vector<1x8xf32>
    %297 = vector.extract_strided_slice %32 {offsets = [3, 0], sizes = [1, 8], strides = [1, 1]} : vector<4x8xf32> to vector<1x8xf32>
    %cst_102 = arith.constant dense<0.000000e+00> : vector<1x8xf32>
    %298 = tpu.matmul %297, %292, %cst_102 {dimension_numbers = #tpu.dot_dimension_numbers<[1], [1], [0], [0], [0, 0, 1, 0], [], []>} : vector<1x8xf32>, vector<8x8xf32>, vector<1x8xf32> -> vector<1x8xf32>
    %299 = vector.extract_strided_slice %294 {offsets = [0, 0], sizes = [8, 8], strides = [1, 1]} : vector<8x16xf32> to vector<8x8xf32>
    %300 = vector.broadcast %296 : vector<1x8xf32> to vector<8x8xf32>
    %301 = arith.addf %299, %300 : vector<8x8xf32>
    %302 = vector.extract_strided_slice %294 {offsets = [0, 8], sizes = [8, 8], strides = [1, 1]} : vector<8x16xf32> to vector<8x8xf32>
    %303 = vector.broadcast %298 : vector<1x8xf32> to vector<8x8xf32>
    %304 = arith.addf %302, %303 : vector<8x8xf32>
    %cst_103 = arith.constant 0.000000e+00 : f32
    %305 = vector.broadcast %cst_103 : f32 to vector<8x8xf32>
    %c7_i32_104 = arith.constant 7 : i32
    %306 = vector.broadcast %c7_i32_104 : i32 to vector<8x8xi32>
    %307 = arith.cmpi eq, %34, %306 : vector<8x8xi32>
    %308 = arith.select %307, %304, %305 : vector<8x8xi1>, vector<8x8xf32>
    %309 = vector.extract_strided_slice %304 {offsets = [0, 1], sizes = [8, 7], strides = [1, 1]} : vector<8x8xf32> to vector<8x7xf32>
    %cst_105 = arith.constant 0.000000e+00 : f32
    %310 = vector.broadcast %cst_105 : f32 to vector<8x1xf32>
    %311 = tpu.concatenate %309, %310 in 1 : vector<8x7xf32>, vector<8x1xf32> -> vector<8x8xf32>
    %c6_i32_106 = arith.constant 6 : i32
    %312 = vector.broadcast %c6_i32_106 : i32 to vector<8x8xi32>
    %313 = arith.cmpi eq, %34, %312 : vector<8x8xi32>
    %314 = arith.select %313, %311, %308 : vector<8x8xi1>, vector<8x8xf32>
    %315 = vector.extract_strided_slice %304 {offsets = [0, 2], sizes = [8, 6], strides = [1, 1]} : vector<8x8xf32> to vector<8x6xf32>
    %cst_107 = arith.constant 0.000000e+00 : f32
    %316 = vector.broadcast %cst_107 : f32 to vector<8x2xf32>
    %317 = tpu.concatenate %315, %316 in 1 : vector<8x6xf32>, vector<8x2xf32> -> vector<8x8xf32>
    %c5_i32_108 = arith.constant 5 : i32
    %318 = vector.broadcast %c5_i32_108 : i32 to vector<8x8xi32>
    %319 = arith.cmpi eq, %34, %318 : vector<8x8xi32>
    %320 = arith.select %319, %317, %314 : vector<8x8xi1>, vector<8x8xf32>
    %321 = vector.extract_strided_slice %304 {offsets = [0, 3], sizes = [8, 5], strides = [1, 1]} : vector<8x8xf32> to vector<8x5xf32>
    %cst_109 = arith.constant 0.000000e+00 : f32
    %322 = vector.broadcast %cst_109 : f32 to vector<8x3xf32>
    %323 = tpu.concatenate %321, %322 in 1 : vector<8x5xf32>, vector<8x3xf32> -> vector<8x8xf32>
    %c4_i32_110 = arith.constant 4 : i32
    %324 = vector.broadcast %c4_i32_110 : i32 to vector<8x8xi32>
    %325 = arith.cmpi eq, %34, %324 : vector<8x8xi32>
    %326 = arith.select %325, %323, %320 : vector<8x8xi1>, vector<8x8xf32>
    %327 = vector.extract_strided_slice %304 {offsets = [0, 4], sizes = [8, 4], strides = [1, 1]} : vector<8x8xf32> to vector<8x4xf32>
    %cst_111 = arith.constant 0.000000e+00 : f32
    %328 = vector.broadcast %cst_111 : f32 to vector<8x4xf32>
    %329 = tpu.concatenate %327, %328 in 1 : vector<8x4xf32>, vector<8x4xf32> -> vector<8x8xf32>
    %c3_i32_112 = arith.constant 3 : i32
    %330 = vector.broadcast %c3_i32_112 : i32 to vector<8x8xi32>
    %331 = arith.cmpi eq, %34, %330 : vector<8x8xi32>
    %332 = arith.select %331, %329, %326 : vector<8x8xi1>, vector<8x8xf32>
    %333 = vector.extract_strided_slice %304 {offsets = [0, 5], sizes = [8, 3], strides = [1, 1]} : vector<8x8xf32> to vector<8x3xf32>
    %cst_113 = arith.constant 0.000000e+00 : f32
    %334 = vector.broadcast %cst_113 : f32 to vector<8x5xf32>
    %335 = tpu.concatenate %333, %334 in 1 : vector<8x3xf32>, vector<8x5xf32> -> vector<8x8xf32>
    %c2_i32_114 = arith.constant 2 : i32
    %336 = vector.broadcast %c2_i32_114 : i32 to vector<8x8xi32>
    %337 = arith.cmpi eq, %34, %336 : vector<8x8xi32>
    %338 = arith.select %337, %335, %332 : vector<8x8xi1>, vector<8x8xf32>
    %339 = vector.extract_strided_slice %304 {offsets = [0, 6], sizes = [8, 2], strides = [1, 1]} : vector<8x8xf32> to vector<8x2xf32>
    %cst_115 = arith.constant 0.000000e+00 : f32
    %340 = vector.broadcast %cst_115 : f32 to vector<8x6xf32>
    %341 = tpu.concatenate %339, %340 in 1 : vector<8x2xf32>, vector<8x6xf32> -> vector<8x8xf32>
    %c1_i32_116 = arith.constant 1 : i32
    %342 = vector.broadcast %c1_i32_116 : i32 to vector<8x8xi32>
    %343 = arith.cmpi eq, %34, %342 : vector<8x8xi32>
    %344 = arith.select %343, %341, %338 : vector<8x8xi1>, vector<8x8xf32>
    %345 = vector.extract_strided_slice %304 {offsets = [0, 7], sizes = [8, 1], strides = [1, 1]} : vector<8x8xf32> to vector<8x1xf32>
    %cst_117 = arith.constant 0.000000e+00 : f32
    %346 = vector.broadcast %cst_117 : f32 to vector<8x7xf32>
    %347 = tpu.concatenate %345, %346 in 1 : vector<8x1xf32>, vector<8x7xf32> -> vector<8x8xf32>
    %c0_i32_118 = arith.constant 0 : i32
    %348 = vector.broadcast %c0_i32_118 : i32 to vector<8x8xi32>
    %349 = arith.cmpi eq, %34, %348 : vector<8x8xi32>
    %350 = arith.select %349, %347, %344 : vector<8x8xi1>, vector<8x8xf32>
    %351 = arith.addf %301, %350 : vector<8x8xf32>
    %cst_119 = arith.constant 0xFF800000 : f32
    %352 = vector.broadcast %cst_119 : f32 to vector<8x8xf32>
    %353 = arith.select %44, %352, %351 : vector<8x8xi1>, vector<8x8xf32>
    %cst_120 = arith.constant 0.353553385 : f32
    %354 = vector.broadcast %cst_120 : f32 to vector<8x8xf32>
    %355 = arith.mulf %353, %354 : vector<8x8xf32>
    %cst_121 = arith.constant dense<0xFF800000> : vector<8xf32>
    %356 = vector.multi_reduction <maximumf>, %355, %cst_121 [1] : vector<8x8xf32> to vector<8xf32>
    %357 = vector.shape_cast %356 : vector<8xf32> to vector<8x1xf32>
    %358 = vector.broadcast %357 : vector<8x1xf32> to vector<8x8xf32>
    %359 = arith.subf %355, %358 : vector<8x8xf32>
    %360 = math.exp %359 : vector<8x8xf32>
    %cst_122 = arith.constant dense<0.000000e+00> : vector<8xf32>
    %361 = vector.multi_reduction <add>, %360, %cst_122 [1] : vector<8x8xf32> to vector<8xf32>
    %362 = vector.shape_cast %361 : vector<8xf32> to vector<8x1xf32>
    %363 = tpu.reciprocal %362 {approx = true} : vector<8x1xf32> -> vector<8x1xf32>
    %364 = vector.broadcast %363 : vector<8x1xf32> to vector<8x8xf32>
    %365 = arith.mulf %360, %364 : vector<8x8xf32>
    %cst_123 = arith.constant dense<0.000000e+00> : vector<8x8xf32>
    %366 = tpu.matmul %365, %291, %cst_123 {dimension_numbers = #tpu.dot_dimension_numbers<[1], [0], [0], [1], [0, 0, 1, 1], [], []>} : vector<8x8xf32>, vector<8x8xf32>, vector<8x8xf32> -> vector<8x8xf32>
    %367 = vector.extract_strided_slice %33 {offsets = [24, 0], sizes = [8, 32], strides = [1, 1]} : vector<32x32xf32> to vector<8x32xf32>
    %cst_124 = arith.constant dense<0.000000e+00> : vector<8x32xf32>
    %368 = tpu.matmul %366, %367, %cst_124 {dimension_numbers = #tpu.dot_dimension_numbers<[1], [0], [0], [1], [0, 0, 1, 1], [], []>} : vector<8x8xf32>, vector<8x32xf32>, vector<8x32xf32> -> vector<8x32xf32>
    %369 = arith.addf %288, %368 : vector<8x32xf32>
    %c0_125 = arith.constant 0 : index
    %c0_126 = arith.constant 0 : index
    %370 = vector.load %arg12[%c0_125, %c0_126] : memref<32x96xf32, #tpu.memory_space<vmem>>, vector<32x96xf32>
    %c0_127 = arith.constant 0 : index
    %c0_128 = arith.constant 0 : index
    %371 = vector.load %arg13[%c0_127, %c0_128] : memref<1x96xf32, #tpu.memory_space<vmem>>, vector<1x96xf32>
    %c0_129 = arith.constant 0 : index
    %c0_130 = arith.constant 0 : index
    %372 = vector.load %arg14[%c0_129, %c0_130] : memref<32x64xf32, #tpu.memory_space<vmem>>, vector<32x64xf32>
    %c0_131 = arith.constant 0 : index
    %c0_132 = arith.constant 0 : index
    %373 = vector.load %arg15[%c0_131, %c0_132] : memref<1x64xf32, #tpu.memory_space<vmem>>, vector<1x64xf32>
    %c0_133 = arith.constant 0 : index
    %c0_134 = arith.constant 0 : index
    %374 = vector.load %arg16[%c0_133, %c0_134] : memref<32x32xf32, #tpu.memory_space<vmem>>, vector<32x32xf32>
    %c0_135 = arith.constant 0 : index
    %c0_136 = arith.constant 0 : index
    %375 = vector.load %arg17[%c0_135, %c0_136] : memref<1x32xf32, #tpu.memory_space<vmem>>, vector<1x32xf32>
    %cst_137 = arith.constant dense<0.000000e+00> : vector<8x96xf32>
    %376 = tpu.matmul %369, %370, %cst_137 {dimension_numbers = #tpu.dot_dimension_numbers<[1], [0], [0], [1], [0, 0, 1, 1], [], []>} : vector<8x32xf32>, vector<32x96xf32>, vector<8x96xf32> -> vector<8x96xf32>
    %377 = vector.broadcast %371 : vector<1x96xf32> to vector<8x96xf32>
    %378 = arith.addf %376, %377 : vector<8x96xf32>
    %cst_138 = arith.constant dense<0.000000e+00> : vector<8x64xf32>
    %379 = tpu.matmul %1, %372, %cst_138 {dimension_numbers = #tpu.dot_dimension_numbers<[1], [0], [0], [1], [0, 0, 1, 1], [], []>} : vector<8x32xf32>, vector<32x64xf32>, vector<8x64xf32> -> vector<8x64xf32>
    %380 = vector.broadcast %373 : vector<1x64xf32> to vector<8x64xf32>
    %381 = arith.addf %379, %380 : vector<8x64xf32>
    %382 = vector.extract_strided_slice %378 {offsets = [0, 0], sizes = [8, 32], strides = [1, 1]} : vector<8x96xf32> to vector<8x32xf32>
    %383 = vector.extract_strided_slice %381 {offsets = [0, 0], sizes = [8, 32], strides = [1, 1]} : vector<8x64xf32> to vector<8x32xf32>
    %384 = arith.addf %382, %383 : vector<8x32xf32>
    %cst_139 = arith.constant 0.000000e+00 : f32
    %385 = vector.broadcast %cst_139 : f32 to vector<8x32xf32>
    %386 = arith.subf %385, %384 : vector<8x32xf32>
    %387 = math.exp %386 : vector<8x32xf32>
    %cst_140 = arith.constant 1.000000e+00 : f32
    %388 = vector.broadcast %cst_140 : f32 to vector<8x32xf32>
    %389 = arith.addf %388, %387 : vector<8x32xf32>
    %cst_141 = arith.constant 1.000000e+00 : f32
    %390 = vector.broadcast %cst_141 : f32 to vector<8x32xf32>
    %391 = arith.divf %390, %389 : vector<8x32xf32>
    %392 = vector.extract_strided_slice %378 {offsets = [0, 32], sizes = [8, 32], strides = [1, 1]} : vector<8x96xf32> to vector<8x32xf32>
    %393 = vector.extract_strided_slice %381 {offsets = [0, 32], sizes = [8, 32], strides = [1, 1]} : vector<8x64xf32> to vector<8x32xf32>
    %394 = arith.addf %392, %393 : vector<8x32xf32>
    %cst_142 = arith.constant 1.000000e-01 : f32
    %395 = vector.broadcast %cst_142 : f32 to vector<8x32xf32>
    %396 = arith.subf %394, %395 : vector<8x32xf32>
    %cst_143 = arith.constant 0.000000e+00 : f32
    %397 = vector.broadcast %cst_143 : f32 to vector<8x32xf32>
    %398 = arith.subf %397, %396 : vector<8x32xf32>
    %399 = math.exp %398 : vector<8x32xf32>
    %cst_144 = arith.constant 1.000000e+00 : f32
    %400 = vector.broadcast %cst_144 : f32 to vector<8x32xf32>
    %401 = arith.addf %400, %399 : vector<8x32xf32>
    %cst_145 = arith.constant 1.000000e+00 : f32
    %402 = vector.broadcast %cst_145 : f32 to vector<8x32xf32>
    %403 = arith.divf %402, %401 : vector<8x32xf32>
    %404 = vector.extract_strided_slice %378 {offsets = [0, 64], sizes = [8, 32], strides = [1, 1]} : vector<8x96xf32> to vector<8x32xf32>
    %405 = arith.mulf %391, %1 : vector<8x32xf32>
    %cst_146 = arith.constant dense<0.000000e+00> : vector<8x32xf32>
    %406 = tpu.matmul %405, %374, %cst_146 {dimension_numbers = #tpu.dot_dimension_numbers<[1], [0], [0], [1], [0, 0, 1, 1], [], []>} : vector<8x32xf32>, vector<32x32xf32>, vector<8x32xf32> -> vector<8x32xf32>
    %407 = arith.addf %404, %406 : vector<8x32xf32>
    %408 = vector.broadcast %375 : vector<1x32xf32> to vector<8x32xf32>
    %409 = arith.addf %407, %408 : vector<8x32xf32>
    %410 = math.tanh %409 : vector<8x32xf32>
    %cst_147 = arith.constant 1.000000e+00 : f32
    %411 = vector.broadcast %cst_147 : f32 to vector<8x32xf32>
    %412 = arith.subf %411, %403 : vector<8x32xf32>
    %413 = arith.mulf %412, %1 : vector<8x32xf32>
    %414 = arith.mulf %403, %410 : vector<8x32xf32>
    %415 = arith.addf %413, %414 : vector<8x32xf32>
    %416 = vector.shape_cast %415 : vector<8x32xf32> to vector<1x8x32xf32>
    %c0_148 = arith.constant 0 : index
    %c0_149 = arith.constant 0 : index
    %c0_150 = arith.constant 0 : index
    %417 = vector.load %arg18[%c0_148, %c0_149, %c0_150] : memref<1x8x32xf32, #tpu.memory_space<vmem>>, vector<1x8x32xf32>
    tpu.vector_store %arg18[%c0_148, %c0_149, %c0_150], %416 {strides = array<i32>} : memref<1x8x32xf32, #tpu.memory_space<vmem>>, vector<1x8x32xf32>,
    return
  }
  func.func @transform_0(%arg0: i32) -> (i32, i32, i32) {
    %c0_i32 = arith.constant 0 : i32
    %c0_i32_0 = arith.constant 0 : i32
    %c0_i32_1 = arith.constant 0 : i32
    return %arg0, %c0_i32, %c0_i32_0 : i32, i32, i32
  }
  func.func @transform_1(%arg0: i32) -> (i32, i32) {
    %c0_i32 = arith.constant 0 : i32
    %c0_i32_0 = arith.constant 0 : i32
    %c0_i32_1 = arith.constant 0 : i32
    return %c0_i32, %c0_i32_0 : i32, i32
  }
  func.func @transform_2(%arg0: i32) -> (i32, i32, i32) {
    %c0_i32 = arith.constant 0 : i32
    %c0_i32_0 = arith.constant 0 : i32
    %c0_i32_1 = arith.constant 0 : i32
    return %arg0, %c0_i32, %c0_i32_0 : i32, i32, i32
  }
  func.func @transform_3(%arg0: i32) -> (i32, i32) {
    %c0_i32 = arith.constant 0 : i32
    %c0_i32_0 = arith.constant 0 : i32
    %c0_i32_1 = arith.constant 0 : i32
    return %c0_i32, %c0_i32_0 : i32, i32
  }
  func.func @transform_4(%arg0: i32) -> (i32, i32) {
    %c0_i32 = arith.constant 0 : i32
    %c0_i32_0 = arith.constant 0 : i32
    %c0_i32_1 = arith.constant 0 : i32
    return %c0_i32, %c0_i32_0 : i32, i32
  }
  func.func @transform_5(%arg0: i32) -> (i32, i32) {
    %c0_i32 = arith.constant 0 : i32
    %c0_i32_0 = arith.constant 0 : i32
    %c0_i32_1 = arith.constant 0 : i32
    return %c0_i32, %c0_i32_0 : i32, i32
  }
  func.func @transform_6(%arg0: i32) -> (i32, i32) {
    %c0_i32 = arith.constant 0 : i32
    %c0_i32_0 = arith.constant 0 : i32
    %c0_i32_1 = arith.constant 0 : i32
    return %c0_i32, %c0_i32_0 : i32, i32
  }
  func.func @transform_7(%arg0: i32) -> (i32, i32) {
    %c0_i32 = arith.constant 0 : i32
    %c0_i32_0 = arith.constant 0 : i32
    %c0_i32_1 = arith.constant 0 : i32
    return %c0_i32, %c0_i32_0 : i32, i32
  }
  func.func @transform_8(%arg0: i32) -> (i32, i32) {
    %c0_i32 = arith.constant 0 : i32
    %c0_i32_0 = arith.constant 0 : i32
    %c0_i32_1 = arith.constant 0 : i32
    return %c0_i32, %c0_i32_0 : i32, i32
  }
  func.func @transform_9(%arg0: i32) -> (i32, i32) {
    %c0_i32 = arith.constant 0 : i32
    %c0_i32_0 = arith.constant 0 : i32
    %c0_i32_1 = arith.constant 0 : i32
    return %c0_i32, %c0_i32_0 : i32, i32
  }
  func.func @transform_10(%arg0: i32) -> (i32, i32) {
    %c0_i32 = arith.constant 0 : i32
    %c0_i32_0 = arith.constant 0 : i32
    %c0_i32_1 = arith.constant 0 : i32
    return %c0_i32, %c0_i32_0 : i32, i32
  }
  func.func @transform_11(%arg0: i32) -> (i32, i32) {
    %c0_i32 = arith.constant 0 : i32
    %c0_i32_0 = arith.constant 0 : i32
    %c0_i32_1 = arith.constant 0 : i32
    return %c0_i32, %c0_i32_0 : i32, i32
  }
  func.func @transform_12(%arg0: i32) -> (i32, i32) {
    %c0_i32 = arith.constant 0 : i32
    %c0_i32_0 = arith.constant 0 : i32
    %c0_i32_1 = arith.constant 0 : i32
    return %c0_i32, %c0_i32_0 : i32, i32
  }
  func.func @transform_13(%arg0: i32) -> (i32, i32) {
    %c0_i32 = arith.constant 0 : i32
    %c0_i32_0 = arith.constant 0 : i32
    %c0_i32_1 = arith.constant 0 : i32
    return %c0_i32, %c0_i32_0 : i32, i32
  }
  func.func @transform_14(%arg0: i32) -> (i32, i32) {
    %c0_i32 = arith.constant 0 : i32
    %c0_i32_0 = arith.constant 0 : i32
    %c0_i32_1 = arith.constant 0 : i32
    return %c0_i32, %c0_i32_0 : i32, i32
  }
  func.func @transform_15(%arg0: i32) -> (i32, i32) {
    %c0_i32 = arith.constant 0 : i32
    %c0_i32_0 = arith.constant 0 : i32
    %c0_i32_1 = arith.constant 0 : i32
    return %c0_i32, %c0_i32_0 : i32, i32
  }
  func.func @transform_16(%arg0: i32) -> (i32, i32) {
    %c0_i32 = arith.constant 0 : i32
    %c0_i32_0 = arith.constant 0 : i32
    %c0_i32_1 = arith.constant 0 : i32
    return %c0_i32, %c0_i32_0 : i32, i32
  }
  func.func @transform_17(%arg0: i32) -> (i32, i32, i32) {
    %c0_i32 = arith.constant 0 : i32
    %c0_i32_0 = arith.constant 0 : i32
    %c0_i32_1 = arith.constant 0 : i32
    return %arg0, %c0_i32, %c0_i32_0 : i32, i32, i32
  }
}

</mosaic_0001>

<bundles_post_ra>
// kernel: tpu_custom_call.1
= control target key start
LH: loop header
LB: loop body
LE: loop exit
PB: predicated region body
PF: predicated region fallthrough
CT: control target
= control target key end

     0   :  { %s4965_s0 = inlined_call_operand.hbm [shape: f32[2,8,32], index: 0, kind: input, shape index: {}]   ;;  %s4966_s1 = inlined_call_operand.hbm [shape: f32[8,32], index: 1, kind: input, shape index: {}]   ;;  %s4967_s2 = inlined_call_operand.hbm [shape: s32[2,1,8], index: 2, kind: input, shape index: {}]   ;;  %s4968_s3 = inlined_call_operand.hbm [shape: f32[32,32], index: 3, kind: input, shape index: {}]   ;;  %s4969_s4 = inlined_call_operand.hbm [shape: f32[32,64], index: 4, kind: input, shape index: {}]   ;;  %s4970_s5 = inlined_call_operand.hbm [shape: f32[32,32], index: 5, kind: input, shape index: {}]   ;;  %s4971_s6 = inlined_call_operand.hbm [shape: f32[32,32], index: 6, kind: input, shape index: {}]   ;;  %s4972_s7 = inlined_call_operand.vmem [shape: f32[4,8], index: 7, kind: input, shape index: {}]   ;;  %s4973_s8 = inlined_call_operand.vmem [shape: f32[4,8], index: 8, kind: input, shape index: {}]   ;;  %s4974_s9 = inlined_call_operand.vmem [shape: f32[1,32], index: 9, kind: input, shape index: {}]   ;;  %s4975_s10 = inlined_call_operand.vmem [shape: f32[1,32], index: 10, kind: input, shape index: {}]   ;;  %s4976_s11 = inlined_call_operand.hbm [shape: f32[32,96], index: 11, kind: input, shape index: {}]   ;;  %s4977_s12 = inlined_call_operand.vmem [shape: f32[1,96], index: 12, kind: input, shape index: {}]   ;;  %s4978_s13 = inlined_call_operand.hbm [shape: f32[32,64], index: 13, kind: input, shape index: {}]   ;;  %s4979_s14 = inlined_call_operand.vmem [shape: f32[1,64], index: 14, kind: input, shape index: {}]   ;;  %s4980_s15 = inlined_call_operand.hbm [shape: f32[32,32], index: 15, kind: input, shape index: {}]   ;;  %s4981_s16 = inlined_call_operand.vmem [shape: f32[1,32], index: 16, kind: input, shape index: {}]   ;;  %s4982_s17 = inlined_call_operand.hbm [shape: f32[2,8,32], index: 17, kind: output, shape index: {}]  }
   0x1   :  { %5009 = sst [smem:[#allocation32_spill]] %s4965_s0 }
   0x2   :  { %5010 = sst [smem:[#allocation33_spill]] %s4966_s1 }
   0x3   :  { %5011 = sst [smem:[#allocation34_spill]] %s4968_s3 }
   0x4   :  { %5012 = sst [smem:[#allocation35_spill]] %s4969_s4 }
   0x5   :  { %5013 = sst [smem:[#allocation36_spill]] %s4971_s6 }
   0x6   :  { %5014 = sst [smem:[#allocation37_spill]] %s4973_s8 }
   0x7   :  { %5015 = sst [smem:[#allocation38_spill]] %s4977_s12 }
   0x8   :  { %5016 = sst [smem:[#allocation39_spill]] %s4978_s13 }
   0x9   :  { %5017 = sst [smem:[#allocation40_spill]] %s4979_s14 }
   0xa   :  { %5018 = sst [smem:[#allocation41_spill]] %s4981_s16 }
   0xb   :  { %5019 = sst [smem:[#allocation42_spill]] %s4982_s17 }
   0xc   :  { %22 = vsyncpa [#allocation3], 0 }
   0xd   :  { %24 = vsyncpa [#allocation3 + $0x1], 0 }
   0xe   :  { %25 = vsyncpa [#allocation6], 0 }
   0xf   :  { %26 = vsyncpa [#allocation10], 0 }
  0x10   :  { %27 = vsyncpa [#allocation13], 0 }
  0x11   :  { %28 = vsyncpa [#allocation16], 0 }
  0x12   :  { %29 = vsyncpa [#allocation4], 0 }
  0x13   :  { %31 = vsyncpa [#allocation4 + $0x1], 0  ;;  %s4243_s24 = smov 0   ;;  %s4245_s25 = smov 0  }
  0x14   :  { %s4247_s26 = smov 0   ;;  %s4249_s27 = smov 0  }
  0x15 LB: > { %5020 = sst [smem:[#allocation27_spill]] %s4106_s24  ;;  %s4120_s28 = smov [#allocation5]   ;;  %s4118_s27 = sphi %s4249_s27, %s5089_s27   ;;  %s4114_s26 = sphi %s4247_s26, %s5093_s26   ;;  %s4110_s25 = sphi %s4245_s25, %s5092_s25   ;;  %s4106_s24 = sphi %s4243_s24, %s5091_s24  }
  0x16   : > { %s448_s29 = sshll.u32 %s4120_s28, 4  ;;  %s4264_s0 = sadd.s32 4294967295, %s4118_s27   ;;  %s449_s29 = int_to_ptr.vmem [resolvable:$true] %s448_s29 }
  0x17   : > { %p3259_p0 = scmp.ge.s32.totalorder %s4118_s27, 1  ;;  %p4996_p1 = scmp.eq.s32.totalorder %s4264_s0, 0 }
  0x18   : > { %p435_p2 = scmp.lt.s32.totalorder %s4118_s27, 3  ;;  %s4121_s18 = smov [#allocation9]  }
  0x19   : > { %s471_s19 = sshll.u32 %s4121_s18, 4  ;;  %s4122_s20 = smov [#allocation12]   ;;  %s4282_s19 = int_to_ptr.vmem [resolvable:$true] %s471_s19 }
  0x1a   : > { %p4269_p3 = pnand %p3259_p0, %p435_p2  ;;  %s497_s21 = sshll.u32 %s4122_s20, 4  ;;  %s4284_s21 = int_to_ptr.vmem [resolvable:$true] %s497_s21 }
  0x1b   : > { %s3777_s23 = scalar_lea.vmem %s449_s29, 128  ;;  %p3785_p11 = scmp.lt.s32.totalorder %s449_s29, %s449_s29 }
  0x1c   : > { %s5021_s30 = scalar_select %p4269_p3, 1, 0 }
  0x1d   : > { %p3621_p5 = pneg %p4269_p3  ;;  %p3778_p8 = scmp.ne.s32.totalorder %s449_s29, %s3777_s23 }
  0x1e   : > { %p3786_p12 = scmp.lt.s32.totalorder %s3777_s23, %s3777_s23 }
  0x1f   : > { %p4278_p6 = pnand %p3621_p5, %p4996_p1 }
  0x20   : > { %p3787_p13 = por %p3786_p12, %p3785_p11 }
  0x21   : > { %s5022_s1 = scalar_select %p4278_p6, 1, 0 }
  0x22   : > { %p4288_p7 = pneg %p4278_p6 }
  0x24   : > { %p3780_p9 = pnand %p3778_p8, %p4288_p7 }
  0x26   : > { %p3781_p10 = pneg %p3780_p9 }
  0x28   : > { %p3788_p0 = pnand %p3787_p13, %p3781_p10 }
  0x2a   : > { %3791 = shalt.err (!%p3788_p0)
}
  0x2b   : > { %s5024_s20 = sld [smem:[#allocation33_spill]]  ;;  %s3803_s17 = scalar_lea.vmem %s4282_s19, 512 }
  0x2c   : > { %p3804_p2 = scmp.ne.s32.totalorder %s4282_s19, %s3803_s17  ;;  %p3811_p9 = scmp.lt.s32.totalorder %s4282_s19, %s4282_s19 }
  0x2d   : > { %p3812_p11 = scmp.lt.s32.totalorder %s3803_s17, %s3803_s17 }
  0x2e   : > { %p3806_p5 = pnand %p3804_p2, %p4288_p7 }
  0x2f   : > { %p3813_p10 = por %p3812_p11, %p3811_p9 }
  0x30   : > { %p3807_p8 = pneg %p3806_p5 }
  0x31   : > { %3624 = dma.hbm_to_vmem [thread:$0]  (!%p4278_p6), %s5024_s20, 128, %s449_s29, [#allocation6]  }
  0x32   : > { %p3814_p12 = pnand %p3813_p10, %p3807_p8 }
  0x34   : > { %3817 = shalt.err (!%p3814_p12)
}
  0x35   : > { %s4985_s23 = smov 128   ;;  %s4987_s28 = smov 8  }
  0x36   : > { %s5025_s4 = sld [smem:[#allocation35_spill]]  ;;  %s3829_s17 = scalar_lea.vmem %s4284_s21, 512 }
  0x37   : > { %p3830_p13 = scmp.ne.s32.totalorder %s4284_s21, %s3829_s17  ;;  %p3837_p5 = scmp.lt.s32.totalorder %s4284_s21, %s4284_s21 }
  0x38   : > { %p3838_p8 = scmp.lt.s32.totalorder %s3829_s17, %s3829_s17 }
  0x39   : > { %p3832_p0 = pnand %p3830_p13, %p4288_p7 }
  0x3a   : > { %p3839_p9 = por %p3838_p8, %p3837_p5 }
  0x3b   : > { %p3833_p2 = pneg %p3832_p0 }
  0x3c   : > { %3630 = dma.hbm_to_vmem [thread:$0]  (!%p4278_p6), %s5025_s4, 512, %s4282_s19, [#allocation10], %s4985_s23, %s4985_s23, %s4987_s28  }
  0x3d   : > { %p3840_p11 = pnand %p3839_p9, %p3833_p2 }
  0x3f   : > { %3843 = shalt.err (!%p3840_p11)
}
  0x40   : > { %s5026_s6 = sld [smem:[#allocation36_spill]]  ;;  %s4125_s19 = smov [#allocation15]  }
  0x41   : > { %s538_s18 = sshll.u32 %s4125_s19, 4  ;;  %s539_s18 = int_to_ptr.vmem [resolvable:$true] %s538_s18 }
  0x42   : > { %s3855_s4 = scalar_lea.vmem %s539_s18, 512  ;;  %p3863_p0 = scmp.lt.s32.totalorder %s539_s18, %s539_s18 }
  0x43   : > { %p3856_p10 = scmp.ne.s32.totalorder %s539_s18, %s3855_s4  ;;  %p3864_p2 = scmp.lt.s32.totalorder %s3855_s4, %s3855_s4 }
  0x45   : > { %p3858_p12 = pnand %p3856_p10, %p4288_p7  ;;  %p3865_p5 = por %p3864_p2, %p3863_p0 }
  0x46   : > { %3636 = dma.hbm_to_vmem [thread:$0]  (!%p4278_p6), %s5026_s6, 512, %s4284_s21, [#allocation13], %s4985_s23, %s4985_s23, %s4987_s28  }
  0x47   : > { %p3859_p13 = pneg %p3858_p12 }
  0x49   : > { %p3866_p8 = pnand %p3865_p5, %p3859_p13 }
  0x4b   : > { %3869 = shalt.err (!%p3866_p8)
}
  0x4c   : > { %s5027_s13 = sld [smem:[#allocation39_spill]]  ;;  %s3258_s4 = sadd.s32 4294967294, %s4118_s27  }
  0x4d   : > { %s4341_s20 = sadd.s32 1, %s4118_s27   ;;  %s44_s19 = sadd.s32 1, %s4114_s26 }
  0x4e   : > { %5028 = sst [smem:[#allocation28_spill]] %s4341_s20  ;;  %s41_s29 = ssub.s32 %s4118_s27, %s4341_s20 }
  0x4f   : > { %p42_p9 = scmp.eq.s32.totalorder %s41_s29, 0  ;;  %p51_p11 = scmp.ne.s32.totalorder %s4114_s26, %s4110_s25 }
  0x50   : > { %p52_p10 = scmp.eq.s32.totalorder %s4118_s27, 0  ;;  %p57_p12 = scmp.ne.s32.totalorder %s4110_s25, %s4106_s24 }
  0x51   : > { %s4352_s17 = scalar_select %p42_p9, %s4114_s26, %s44_s19  }
  0x52   : > { %3642 = dma.hbm_to_vmem [thread:$0]  (!%p4278_p6), %s5027_s13, 512, %s539_s18, [#allocation16], %s4985_s23, %s4985_s23, %s4987_s28  }
  0x53   : > { %5029 = sst [smem:[#allocation29_spill]] %s4352_s17  ;;  %p4354_p13 = por %p52_p10, %p51_p11 }
  0x54   : > { %p4360_p0 = por %p4996_p1, %p57_p12  ;;  %p422_p2 = scmp.eq.s32.totalorder %s4264_s0, 1 }
  0x55   : > { %p428_p5 = scmp.eq.s32.totalorder %s3258_s4, 1  ;;  %p3665_p8 = scmp.lt.s32.totalorder %s4118_s27, 2 }
  0x56   : > { %s5031_s18 = scalar_select %p4360_p0, 1, 0 }
  0x57   : > { %s571_s23 = sand.u32 1, %s4118_s27   ;;  %p4367_p4 = por %p422_p2, %p51_p11 }
  0x58   : > { %p4371_p9 = por %p428_p5, %p57_p12  ;;  %s4994_s28 = sand.u32 1, %s4114_s26  }
  0x59   : > { %s5032_s29 = scalar_select %p4367_p4, 1, 0 }
  0x5a   : > { %s5034_s19 = scalar_select %p4371_p9, 1, 0 }
  0x5b   : > { %5033 = sst [smem:[#allocation30_spill]] %s5032_s29  ;;  %s3269_s6 = sshll.u32 %s4994_s28, 3 }
  0x5c   : > { %5035 = sst [smem:[#allocation31_spill]] %s5034_s19  ;;  %s3270_s13 = sshll.u32 %s4118_s27, 7 }
  0x5d   : > { %s5036_s24 = sld [smem:[#allocation32_spill]]  ;;  %s575_s4 = scalar_lea.vmem [#allocation2], %s3269_s6 }
  0x5e   : > { %s582_s14 = sshll.u32 %s575_s4, 4  ;;  %p4386_p11 = pnand %p3665_p8, %p4354_p13  ;;  %s4390_s14 = int_to_ptr.vmem [resolvable:$true] %s582_s14 }
  0x5f   : > { %s4126_s28 = smov [#allocation8]   ;;  %s4392_s8 = scalar_lea.sflag [#allocation3], %s571_s23 }
  0x60   : > { %s458_s19 = sshll.u32 %s4126_s28, 4  ;;  %p5002_p12 = pneg %p4386_p11  ;;  %s459_s19 = int_to_ptr.vmem [resolvable:$true] %s458_s19 }
  0x63   : > { %s5037_s16 = smov %s5036_s24  ;;  %s4382_s12 = scalar_lea.hbm %s5036_s24, %s3270_s13 }
  0x64   : > { %s3870_s13 = scalar_lea.hbm %s4382_s12, 128  ;;  %s3875_s20 = scalar_lea.hbm %s5037_s16, 256 }
  0x65   : > { %p3871_p10 = scmp.ne.s32.totalorder %s4382_s12, %s3870_s13  ;;  %p3876_p13 = scmp.lt.s32.totalorder %s4382_s12, %s5037_s16 }
  0x66   : > { %p3877_p8 = scmp.lt.s32.totalorder %s3875_s20, %s3870_s13 }
  0x67   : > { %p3873_p2 = pnand %p5002_p12, %p3871_p10 }
  0x68   : > { %p3878_p1 = por %p3877_p8, %p3876_p13 }
  0x69   : > { %p3874_p5 = pneg %p3873_p2 }
  0x6b   : > { %p3879_p9 = pnand %p3878_p1, %p3874_p5 }
  0x6d   : > { %3882 = shalt.err (!%p3879_p9)
}
  0x6e   : > { %s3883_s23 = scalar_lea.vmem %s4390_s14, 128  ;;  %s4127_s28 = smov [#allocation2]  }
  0x6f   : > { %p3884_p4 = scmp.ne.s32.totalorder %s4390_s14, %s3883_s23  ;;  %s3888_s4 = sshll.u32 %s4127_s28, 4  ;;  %s3889_s4 = int_to_ptr.vmem [resolvable:$false] %s3888_s4 }
  0x70   : > { %s3890_s6 = scalar_lea.vmem %s3889_s4, 256  ;;  %p3891_p0 = scmp.lt.s32.totalorder %s4390_s14, %s3889_s4 }
  0x71   : > { %p3886_p10 = pnand %p3884_p4, %p5002_p12  ;;  %p3892_p3 = scmp.lt.s32.totalorder %s3890_s6, %s3883_s23 }
  0x73   : > { %p3887_p2 = pneg %p3886_p10  ;;  %p3893_p6 = por %p3892_p3, %p3891_p0 }
  0x75   : > { %p3894_p13 = pnand %p3893_p6, %p3887_p2 }
  0x77   : > { %3897 = shalt.err (!%p3894_p13)
}
  0x78   : > { %3649 = dma.hbm_to_vmem [thread:$0]  (!%p4386_p11), %s4382_s12, 128, %s4390_s14, %s4392_s8  }
  0x79   : > { %s3909_s13 = scalar_lea.vmem %s459_s19, 512  ;;  %p3917_p5 = scmp.lt.s32.totalorder %s459_s19, %s459_s19 }
  0x7a   : > { %p3910_p1 = scmp.ne.s32.totalorder %s459_s19, %s3909_s13  ;;  %p3918_p8 = scmp.lt.s32.totalorder %s3909_s13, %s3909_s13 }
  0x7c   : > { %p3912_p4 = pnand %p3910_p1, %p4288_p7  ;;  %p3919_p10 = por %p3918_p8, %p3917_p5 }
  0x7e   : > { %p3913_p9 = pneg %p3912_p4 }
  0x80   : > { %p3920_p12 = pnand %p3919_p10, %p3913_p9 }
  0x82   : > { %3923 = shalt.err (!%p3920_p12)
}
  0x83   : > { %p5039_p3 = scmp.ne.s32.totalorder %s5022_s1, 0  ;;  %s5040_s24 = smov 8  }
  0x84   : > { %s5041_s20 = smov 128   ;;  %s5042_s3 = sld [smem:[#allocation34_spill]] }
  0x85   : > { %s4128_s12 = smov [#allocation11]   ;;  %s4129_s23 = smov [#allocation14]  }
  0x86   : > { %s484_s14 = sshll.u32 %s4128_s12, 4  ;;  %s522_s28 = sshll.u32 %s4129_s23, 4  ;;  %s485_s14 = int_to_ptr.vmem [resolvable:$true] %s484_s14  ;;  %s523_s28 = int_to_ptr.vmem [resolvable:$true] %s522_s28 }
  0x87   : > { %s3935_s4 = scalar_lea.vmem %s485_s14, 512  ;;  %p3943_p2 = scmp.lt.s32.totalorder %s485_s14, %s485_s14 }
  0x88   : > { %p3936_p6 = scmp.ne.s32.totalorder %s485_s14, %s3935_s4  ;;  %p3944_p13 = scmp.lt.s32.totalorder %s3935_s4, %s3935_s4 }
  0x8a   : > { %3627 = dma.hbm_to_vmem [thread:$0]  (!%p5039_p3), %s5042_s3, 512, %s459_s19, [#allocation6], %s5041_s20, %s5041_s20, %s5040_s24  }
  0x8b   : > { %p3938_p0 = pnand %p3936_p6, %p4288_p7  ;;  %p3945_p1 = por %p3944_p13, %p3943_p2 }
  0x8d   : > { %p3939_p12 = pneg %p3938_p0 }
  0x8f   : > { %p3946_p4 = pnand %p3945_p1, %p3939_p12 }
  0x91   : > { %3949 = shalt.err (!%p3946_p4)
}
  0x92   : > { %3633 = dma.hbm_to_vmem [thread:$0]  (!%p5039_p3), %s4970_s5, 512, %s485_s14, [#allocation10], %s5041_s20, %s5041_s20, %s5040_s24  }
  0x93   : > { %s3961_s13 = scalar_lea.vmem %s523_s28, 512  ;;  %p3969_p10 = scmp.lt.s32.totalorder %s523_s28, %s523_s28 }
  0x94   : > { %p3962_p9 = scmp.ne.s32.totalorder %s523_s28, %s3961_s13  ;;  %p3970_p6 = scmp.lt.s32.totalorder %s3961_s13, %s3961_s13 }
  0x96   : > { %p3964_p5 = pnand %p3962_p9, %p4288_p7  ;;  %p3971_p0 = por %p3970_p6, %p3969_p10 }
  0x98   : > { %p3965_p8 = pneg %p3964_p5 }
  0x9a   : > { %p3972_p12 = pnand %p3971_p0, %p3965_p8 }
  0x9c   : > { %3975 = shalt.err (!%p3972_p12)
}
  0x9d   : > { %3639 = dma.hbm_to_vmem [thread:$0]  (!%p5039_p3), %s4976_s11, 512, %s523_s28, [#allocation13], %s5041_s20, %s5041_s20, %s5040_s24  }
  0x9e   : > { %s4130_s12 = smov [#allocation17]   ;;  %s3271_s23 = sshll.u32 %s4118_s27, 4 }
  0x9f   : > { %s554_s14 = sshll.u32 %s4130_s12, 4  ;;  %s555_s14 = int_to_ptr.vmem [resolvable:$true] %s554_s14 }
  0xa0   : > { %s3987_s4 = scalar_lea.vmem %s555_s14, 512  ;;  %p3995_p4 = scmp.lt.s32.totalorder %s555_s14, %s555_s14 }
  0xa1   : > { %p3988_p2 = scmp.ne.s32.totalorder %s555_s14, %s3987_s4  ;;  %p3996_p9 = scmp.lt.s32.totalorder %s3987_s4, %s3987_s4 }
  0xa3   : > { %p3990_p13 = pnand %p3988_p2, %p4288_p7  ;;  %p3997_p5 = por %p3996_p9, %p3995_p4 }
  0xa5   : > { %p3991_p1 = pneg %p3990_p13 }
  0xa7   : > { %p3998_p8 = pnand %p3997_p5, %p3991_p1 }
  0xa9   : > { %4001 = shalt.err (!%p3998_p8)
}
  0xaa   : > { %3645 = dma.hbm_to_vmem [thread:$0]  (!%p5039_p3), %s4980_s15, 512, %s555_s14, [#allocation16], %s5041_s20, %s5041_s20, %s5040_s24  }
  0xab   : > { %s597_s13 = scalar_lea.hbm %s4967_s2, %s3271_s23  ;;  %s5043_s17 = sand.u32 1, %s4114_s26  }
  0xac   : > { %s592_s21 = scalar_lea.vmem [#allocation7], %s5043_s17  ;;  %s4002_s4 = scalar_lea.hbm %s597_s13, 16 }
  0xad   : > { %s599_s12 = sshll.u32 %s592_s21, 4  ;;  %p4003_p7 = scmp.ne.s32.totalorder %s597_s13, %s4002_s4  ;;  %s600_s12 = int_to_ptr.vmem [resolvable:$true] %s599_s12 }
  0xae   : > { %p5044_p10 = pneg %p4386_p11  ;;  %s4007_s28 = scalar_lea.hbm %s4967_s2, 32 }
  0xaf   : > { %p4008_p3 = scmp.lt.s32.totalorder %s597_s13, %s4967_s2  ;;  %p4009_p12 = scmp.lt.s32.totalorder %s4007_s28, %s4002_s4 }
  0xb0   : > { %p4005_p6 = pnand %p4003_p7, %p5044_p10 }
  0xb1   : > { %p4010_p2 = por %p4009_p12, %p4008_p3 }
  0xb2   : > { %p4006_p0 = pneg %p4005_p6 }
  0xb4   : > { %p4011_p13 = pnand %p4010_p2, %p4006_p0 }
  0xb6   : > { %4014 = shalt.err (!%p4011_p13)
}
  0xb7   : > { %s4015_s20 = scalar_lea.vmem %s600_s12, 16  ;;  %p5045_p4 = pmov %p5044_p10 }
  0xb8   : > { %p4016_p1 = scmp.ne.s32.totalorder %s600_s12, %s4015_s20  ;;  %s4131_s14 = smov [#allocation7]  }
  0xb9   : > { %s4020_s23 = sshll.u32 %s4131_s14, 4  ;;  %s4021_s23 = int_to_ptr.vmem [resolvable:$false] %s4020_s23 }
  0xba   : > { %p4018_p9 = pnand %p4016_p1, %p5045_p4  ;;  %s4022_s3 = scalar_lea.vmem %s4021_s23, 32 }
  0xbb   : > { %p4023_p8 = scmp.lt.s32.totalorder %s600_s12, %s4021_s23  ;;  %p4024_p7 = scmp.lt.s32.totalorder %s4022_s3, %s4015_s20 }
  0xbc   : > { %p4019_p5 = pneg %p4018_p9 }
  0xbd   : > { %p4025_p10 = por %p4024_p7, %p4023_p8 }
  0xbf   : > { %p4026_p6 = pnand %p4025_p10, %p4019_p5 }
  0xc1   : > { %4029 = shalt.err (!%p4026_p6)
}
  0xc2   : > { %3652 = dma.hbm_to_vmem [thread:$0]  (!%p4386_p11), %s597_s13, 16, %s600_s12, %s4392_s8  }
  0xc3   : > { %p5046_p0 = scmp.ne.s32.totalorder %s5021_s30, 0 }
  0xc4   : > { %s610_s6 = sand.u32 (!%p5046_p0), 1, %s4264_s0   ;;  %s4484_s22 = sand.u32 (!%p5046_p0), 1, %s4110_s25  }
  0xc5   : > { %608 = sbr.rel (%p5046_p0) target bundleno = 5282 (0x14a2), region = 88  ;;  %s3273_s17 = sshll.u32 (!%p5046_p0), %s4484_s22, 3 }
  0xc6   : > { %s611_s21 = scalar_lea.sflag (!%p5046_p0), [#allocation3], %s610_s6  ;;  %s4489_s4 = scalar_lea.vmem (!%p5046_p0), [#allocation2], %s3273_s17 }
  0xc7   : > { %p5047_p3 = scmp.ne.s32.totalorder (!%p5046_p0), %s5031_s18, 0 }
  0xca   : > { %4073 = dma.done.wait (%p5047_p3), %s611_s21, 128  }
  0xcb   : > { %4075 = vsyncadd (%p5047_p3), %s611_s21, 4294967168  ;;  %p5048_p11 = scmp.eq.s32.totalorder %s4264_s0, 0 }
  0xcd   : > { %4077 = dma.done.wait (%p5048_p11), [#allocation6], 128   ;;  %p5049_p12 = pmov %p5048_p11 }
  0xce   : > { %s626_s8 = scalar_lea.vmem [#allocation7], %s4484_s22 }
  0xcf   : > { %4079 = vsyncadd (%p5049_p12), [#allocation6], 4294967168 }
  0xd0   : > { %4081 = dma.done.wait (%p5047_p3), %s611_s21, 16  }
  0xd1   : > { %4083 = vsyncadd (%p5047_p3), %s611_s21, 4294967280  ;;  %p5050_p2 = pmov %p5048_p11 }
  0xd3   : > { %4085 = dma.done.wait (%p5050_p2), [#allocation6], 512   ;;  %p5051_p13 = pmov %p5050_p2 }
  0xd4   : > { %p5052_p1 = pmov %p5050_p2 }
  0xd5   : > { %4087 = vsyncadd (%p5051_p13), [#allocation6], 4294966784 }
  0xd6   : > { %4089 = dma.done.wait (%p5052_p1), [#allocation10], 1024   ;;  %p5053_p4 = pmov %p5052_p1 }
  0xd7   : > { %p5054_p9 = pmov %p5052_p1 }
  0xd8   : > { %4091 = vsyncadd (%p5053_p4), [#allocation10], 4294966272 }
  0xd9   : > { %4093 = dma.done.wait (%p5054_p9), [#allocation13], 1024   ;;  %p5055_p5 = pmov %p5052_p1 }
  0xda   : > { %p5056_p8 = pmov %p5052_p1 }
  0xdb   : > { %4095 = vsyncadd (%p5055_p5), [#allocation13], 4294966272 }
  0xdc   : > { %4097 = dma.done.wait (%p5056_p8), [#allocation16], 1024   ;;  %p5057_p7 = pmov %p5052_p1 }
  0xdd   : > { %vm5003_vm0 = vcmask 261120   ;;  %v709_v0 = vld [vmem:[%s4489_s4] sm:$0xff]  ;;  %v744_v7 = vld [vmem:[#allocation8 + $0x18] sm:$0xff]  ;;  %v4132_v9 = vmov 0.0   ;;  %vm4133_vm1 = vmmov 0   ;;  %vm990_vm2 = vcmask 64512  }
  0xde   : > { %4099 = vsyncadd (%p5057_p7), [#allocation16], 4294966272  ;;  %v713_v1 = vsel %vm5003_vm0, %v709_v0, 0.0  ;;  %v821_v8 = vld [vmem:[#allocation9 + $0x18] sm:$0xff]  ;;  %3409 = vmatprep.subr.mxu0 %v4132_v9  ;;  %3420 = vmatprep.subr.mxu1 %v4132_v9  ;;  %v743_v10 = vld [vmem:[#allocation8 + $0x10] sm:$0xff]  ;;  %s5058_s24 = sld [smem:[#allocation37_spill]]  ;;  %v976_v38 = vlaneseq }
  0xdf   : > { %714 = vadd.xlane.f32.xlu0 %v713_v1  ;;  %v820_v11 = vld [vmem:[#allocation9 + $0x10] sm:$0xff]  ;;  %3410 = vmatpush3.msra.mxu0 %v744_v7  ;;  %v742_v12 = vld [vmem:[#allocation8 + $0x8] sm:$0xff]  ;;  %v741_v14 = vld [vmem:[#allocation8] sm:$0xff]  ;;  %s4134_s20 = smov 8   ;;  %s4135_s14 = smov 119   ;;  %vm1236_vm5 = vcmask 56320  }
  0xe0   : > { %3421 = vmatpush3.msra.mxu1 %v821_v8  ;;  %3411 = vmatprep.subr.mxu0 %v4132_v9  ;;  %v819_v13 = vld [vmem:[#allocation9 + $0x8] sm:$0xff]  ;;  %v818_v15 = vld [vmem:[#allocation9] sm:$0xff]  ;;  %v896_v25 = vld [vmem:[#allocation11 + $0x18] sm:$0xff]  ;;  %v4598_v41 = vshrl.u32 %v976_v38, 7  ;;  %s4136_s23 = smov 120   ;;  %s4137_s3 = smov 118  }
  0xe1   : > { %3422 = vmatprep.subr.mxu1 %v4132_v9  ;;  %3412 = vmatpush3.msra.mxu0 %v743_v10  ;;  %v3283_v20 = vld [vmem:[%s4974_s9] ss:$0 sm:$0xff]  ;;  %v895_v26 = vld [vmem:[#allocation11 + $0x10] sm:$0xff]  ;;  %v894_v27 = vld [vmem:[#allocation11 + $0x8] sm:$0xff]  ;;  %s4138_s6 = smov 117   ;;  %s4139_s21 = smov 116  }
  0xe2   : > { %3423 = vmatpush3.msra.mxu1 %v820_v11  ;;  %3413 = vmatprep.subr.mxu0 %v4132_v9  ;;  %v3284_v22 = vld [vmem:[%s4975_s10] ss:$0 sm:$0xff]  ;;  %v892_v29 = vld [vmem:[#allocation5] sm:$0xff]  ;;  %v4603_v44 = vsub.s32 0, %v4598_v41  ;;  %vm5008_vm3 = vcmp.eq.s32.totalorder %v4598_v41, 7  ;;  %s4140_s30 = smov 115  }
  0xe3   : > { %3424 = vmatprep.subr.mxu1 %v4132_v9  ;;  %3414 = vmatpush3.msra.mxu0 %v742_v12  ;;  %v893_v28 = vld [vmem:[#allocation11] sm:$0xff]  ;;  %s4141_s18 = smov 114   ;;  %s4142_s29 = smov 113   ;;  %vm1247_vm6 = vcmask 48128   ;;  %vm5005_vm7 = vcmask 39936   ;;  %v4143_v57 = vmov 0  }
  0xe4   : > { %3425 = vmatpush3.msra.mxu1 %v819_v13  ;;  %3415 = vmatprep.subr.mxu0 %v4132_v9  ;;  %v4577_v36 = vld [vmem:[%s4972_s7] sm:$0xf]  ;;  %vm1238_vm8 = vcmp.eq.s32.totalorder %v4598_v41, 6  ;;  %vm5004_vm9 = vcmask 31744   ;;  %vm5006_vm10 = vcmp.eq.s32.totalorder %v4598_v41, 5  ;;  %vm1256_vm11 = vcmp.eq.s32.totalorder %v4598_v41, 4 }
  0xe5   : > { %3426 = vmatprep.subr.mxu1 %v4132_v9  ;;  %3416 = vmatpush3.msra.mxu0 %v741_v14  ;;  %v4589_v37 = vld [vmem:[%s5058_s24] sm:$0xf]  ;;  %vm1268_vm12 = vcmask 23552   ;;  %vm5007_vm13 = vcmask 15360   ;;  %v979_v63 = vand.u32 127, %v976_v38  ;;  %vm1263_vm14 = vcmp.eq.s32.totalorder %v4598_v41, 3 }
  0xe6   : > { %3417 = vmatprep.mubr.msk.f32.mxu0 %vm4133_vm1, %v4132_v9  ;;  %3427 = vmatpush3.msra.mxu1 %v818_v15  ;;  %v981_v54 = vld [vmem:[%s626_s8] sm:$0x1]  ;;  %vm1270_vm15 = vcmp.eq.s32.totalorder %v4598_v41, 2  ;;  %s4144_s8 = smov 96   ;;  %s4145_s13 = smov 112  }
  0xe7   : > { %3428 = vmatprep.mubr.msk.f32.mxu1 %vm4133_vm1, %v4132_v9  ;;  %3431 = vmatprep.subr.mxu0 %v4132_v9  ;;  %vm982_vm4 = vcmp.gt.s32.totalorder %v981_v54, 0  ;;  %s4146_s12 = smov 88   ;;  %s4147_s1 = smov 80  }
  0xe8   : > { %3442 = vmatprep.subr.mxu1 %v4132_v9  ;;  %v983_v58 = vsel %vm982_vm4, 1, %v4143_v57  ;;  %vm1277_vm4 = vcmp.eq.s32.totalorder %v4598_v41, 1  ;;  %s4148_s28 = smov 104   ;;  %s4149_s19 = smov 72  }
  0xe9   : > { %s4150_s24 = smov 32  }
 0x168   : > { %v715_v2 = vpop.xlane.xlu0 %714 }
 0x169   : > { %v717_v3 = vmul.f32 0.03125, %v715_v2 }
 0x16b   : > { %v718_v4 = vsub.f32 %v709_v0, %v717_v3  ;;  %v987_v0 = vrot.slane %v983_v58, %v4603_v44 }
 0x16d   : > { %v719_v5 = vmul.f32 %v718_v4, %v718_v4 }
 0x16f   : > { %v720_v6 = vsel %vm5003_vm0, %v719_v5, 0.0 }
 0x170   : > { %721 = vadd.xlane.f32.xlu0 %v720_v6 }
 0x1f9   : > { %v722_v16 = vpop.xlane.xlu0 %721 }
 0x1fa   : > { %v723_v17 = vmul.f32 0.03125, %v722_v16 }
 0x1fc   : > { %v724_v18 = vadd.f32 1e-05, %v723_v17 }
 0x1fe   : > { %3737 = vrsqrt.f32 %v724_v18 }
 0x20b   : > { %v3738_v19 = vpop.eup %3737 }
 0x20c   : > { %v726_v21 = vmul.f32 %v3738_v19, %v718_v4 }
 0x20e   : > { %v733_v23 = vmul.f32 %v3283_v20, %v726_v21 }
 0x210   : > { %v740_v24 = vadd.f32 %v3284_v22, %v733_v23 }
 0x212   : > { %3418 = vmatmul.mubr.msk.f32.vlgmr.msra.gmra.mxu0 %vm5003_vm0, %v740_v24  ;;  %3429 = vmatmul.mubr.msk.f32.vlgmr.msra.gmra.mxu1 %vm5003_vm0, %v740_v24 }
 0x213   : > { %3432 = vmatpush3.msra.mxu0 %v896_v25  ;;  %3439 = vmatprep.mubr.msk.f32.mxu0 %vm4133_vm1, %v4132_v9 }
 0x214   : > { %3433 = vmatprep.subr.mxu0 %v4132_v9  ;;  %3446 = vmatprep.mubr.msk.f32.mxu1 %vm4133_vm1, %v4132_v9 }
 0x215   : > { %3434 = vmatpush3.msra.mxu0 %v895_v26 }
 0x216   : > { %3435 = vmatprep.subr.mxu0 %v4132_v9 }
 0x217   : > { %3436 = vmatpush3.msra.mxu0 %v894_v27 }
 0x218   : > { %3437 = vmatprep.subr.mxu0 %v4132_v9 }
 0x219   : > { %3438 = vmatpush3.msra.mxu0 %v893_v28 }
 0x21a   : > { %3440 = vmatmul.mubr.msk.f32.vlgmr.msra.gmra.mxu0 %vm5003_vm0, %v892_v29  ;;  %3459 = vmatprep.subr.mxu0 %v4132_v9  ;;  %vm1282_vm0 = vcmask 7168  }
 0x21b   : > { %3461 = vmatprep.mubr.msk.f32.mxu0 %vm4133_vm1, %v4132_v9 }
 0x2d2   : > { %v4556_v30 = vpop.f32.mrf.mxu0  ;;  %v4558_v31 = vpop.f32.mrf.mxu1 }
 0x2d4   : > { %v3419_v32 = vpop.f32.mrf.mxu0  ;;  %v3430_v33 = vpop.f32.mrf.mxu1 }
 0x2da   : > { %v4560_v34 = vpop.f32.mrf.mxu0 }
 0x2db   : > { %3443 = vmatpush3.xpose.msk.msra.mxu1 %vm990_vm2, %v4560_v34 }
 0x2dc   : > { %v3441_v35 = vpop.f32.mrf.mxu0  ;;  %3444 = vmatprep.subr.mxu1 %v4132_v9 }
 0x2df   : > { %3445 = vmatpush3.xpose.msk.msra.mxu1 %vm990_vm2, %v4558_v31 }
 0x2e0   : > { %3449 = vmatprep.subr.mxu1 %v4132_v9 }
 0x2e2   : > { %3447 = vmatmul.mubr.msk.f32.vlgmr.msra.gmra.mxu1 %vm990_vm2, %v4556_v30 }
 0x2e3   : > { %3450 = vmatpush3.xpose.msk.msra.mxu1 %vm990_vm2, %v4558_v31  ;;  %3451 = vmatprep.mubr.msk.f32.mxu1 %vm4133_vm1, %v4132_v9 }
 0x2e4   : > { %3454 = vmatprep.subr.mxu1 %v4132_v9 }
 0x2e6   : > { %3452 = vmatmul.mubr.msk.f32.vlgmr.msra.gmra.mxu1 %vm990_vm2, %v4577_v36 }
 0x2e7   : > { %3455 = vmatpush3.xpose.msk.msra.mxu1 %vm990_vm2, %v4560_v34  ;;  %3456 = vmatprep.mubr.msk.f32.mxu1 %vm4133_vm1, %v4132_v9 }
 0x2e8   : > { %3464 = vmatprep.subr.mxu1 %v4132_v9 }
 0x2ea   : > { %3457 = vmatmul.mubr.msk.f32.vlgmr.msra.gmra.mxu1 %vm990_vm2, %v4589_v37 }
 0x2eb   : > { %3468 = vmatprep.mubr.msk.f32.mxu1 %vm4133_vm1, %v4132_v9 }
 0x3a2   : > { %v4596_v39 = vpop.f32.mrf.mxu1 }
 0x3a4   : > { %v3448_v40 = vpop.f32.mrf.mxu1 }
 0x3a5   : > { %v1531_v40 = vrot.slane %v4589_v37, 1 }
 0x3a6   : > { %v4600_v42 = vpop.f32.mrf.mxu1 }
 0x3a7   : > { %v1219_v4 = vrot.slane %v4600_v42, %v4603_v44 }
 0x3a8   : > { %v3453_v43 = vpop.f32.mrf.mxu1 }
 0x3a9   : > { %v1220_v13 = vadd.f32 %v1219_v4, %v4596_v39 }
 0x3aa   : > { %v1212_v45 = vpop.f32.mrf.mxu1 }
 0x3ab   : > { %v1224_v46 = vrot.slane %v1212_v45, %v4603_v44 }
 0x3ac   : > { %v3458_v47 = vpop.f32.mrf.mxu1 }
 0x3ad   : > { %1226 = vrot.lane.b32.xlu1 %v1224_v46, %s4134_s20 }
 0x41f   : > { %v1227_v48 = vpop.permute.xlu1 %1226 }
 0x420   : > { %v1229_v49 = vadd.f32 %v1227_v48, %v4596_v39  ;;  %v1458_v39 = vrot.slane %v4577_v36, 1 }
 0x422   : > { %1233 = vrot.lane.b32.xlu1 %v1229_v49, %s4135_s14  ;;  %v1231_v50 = vsel %vm5008_vm3, %v1229_v49, 0.0 }
 0x423   : > { %1240 = vrot.lane.b32.xlu0 %v1231_v50, %s4136_s23 }
 0x426   : > { %1244 = vrot.lane.b32.xlu1 %v1229_v49, %s4137_s3 }
 0x42a   : > { %1251 = vrot.lane.b32.xlu1 %v1229_v49, %s4138_s6 }
 0x42e   : > { %1258 = vrot.lane.b32.xlu1 %v1229_v49, %s4139_s21 }
 0x432   : > { %1265 = vrot.lane.b32.xlu1 %v1229_v49, %s4140_s30 }
 0x436   : > { %1272 = vrot.lane.b32.xlu1 %v1229_v49, %s4141_s18 }
 0x43a   : > { %1279 = vrot.lane.b32.xlu1 %v1229_v49, %s4142_s29 }
 0x494   : > { %v1234_v51 = vpop.permute.xlu1 %1233 }
 0x495   : > { %v1237_v59 = vsel %vm1236_vm5, %v1234_v51, 0.0  ;;  %v1241_v60 = vpop.permute.xlu0 %1240 }
 0x496   : > { %v1243_v1 = vsel %vm1238_vm8, %v1237_v59, %v1241_v60 }
 0x498   : > { %v1245_v52 = vpop.permute.xlu1 %1244 }
 0x499   : > { %v1248_v61 = vsel %vm1247_vm6, %v1245_v52, 0.0 }
 0x49a   : > { %v1250_v5 = vsel %vm5006_vm10, %v1248_v61, %v1243_v1  ;;  %vm988_vm10 = vcmp.eq.s32.totalorder %v987_v0, 1 }
 0x49c   : > { %v1252_v53 = vpop.permute.xlu1 %1251 }
 0x49d   : > { %v1255_v62 = vsel %vm5005_vm7, %v1252_v53, 0.0  ;;  %vm980_vm7 = vcmp.gt.s32.totalorder %v979_v63, %v4598_v41 }
 0x49e   : > { %v1257_v7 = vsel %vm1256_vm11, %v1255_v62, %v1250_v5 }
 0x4a0   : > { %v1259_v55 = vpop.permute.xlu1 %1258 }
 0x4a1   : > { %v1262_v2 = vsel %vm5004_vm9, %v1259_v55, 0.0  ;;  %vm1284_vm9 = vcmp.eq.s32.totalorder %v4598_v41, 0 }
 0x4a2   : > { %v1264_v10 = vsel %vm1263_vm14, %v1262_v2, %v1257_v7 }
 0x4a4   : > { %v1266_v56 = vpop.permute.xlu1 %1265 }
 0x4a5   : > { %v1269_v6 = vsel %vm1268_vm12, %v1266_v56, 0.0 }
 0x4a6   : > { %v1271_v11 = vsel %vm1270_vm15, %v1269_v6, %v1264_v10 }
 0x4a8   : > { %v1273_v3 = vpop.permute.xlu1 %1272 }
 0x4a9   : > { %v1276_v8 = vsel %vm5007_vm13, %v1273_v3, 0.0  ;;  %vm4654_vm13 = vmor %vm980_vm7, %vm988_vm10  ;;  %vm5061_vm7 = vcmp.eq.s32.totalorder %v4598_v41, 5  ;;  %vm5062_vm10 = vcmask 39936  }
 0x4aa   : > { %v1278_v14 = vsel %vm1277_vm4, %v1276_v8, %v1271_v11 }
 0x4ac   : > { %v1280_v12 = vpop.permute.xlu1 %1279 }
 0x4ad   : > { %v1283_v15 = vsel %vm1282_vm0, %v1280_v12, 0.0 }
 0x4ae   : > { %v1285_v16 = vsel %vm1284_vm9, %v1283_v15, %v1278_v14 }
 0x4af   : > { %v1286_v18 = vadd.f32 %v1285_v16, %v1220_v13 }
 0x4b1   : > { %v1287_v19 = vsel %vm4654_vm13, -inf, %v1286_v18 }
 0x4b2   : > { %v1288_v20 = vmul.f32 0.35355338, %v1287_v19 }
 0x4b4   : > { %v1289_v21 = vsel %vm990_vm2, %v1288_v20, -inf }
 0x4b5   : > { %1290 = vmax.xlane.f32.xlu0 %v1289_v21 }
 0x4cb   : > { %1300 = vrot.lane.b32.xlu0 %v4558_v31, %s4144_s8 }
 0x4cf   : > { %1380 = vrot.lane.b32.xlu0 %v4560_v34, %s4136_s23 }
 0x53e   : > { %v1291_v22 = vpop.xlane.xlu0 %1290 }
 0x53f   : > { %v1292_v23 = vsub.f32 %v1288_v20, %v1291_v22 }
 0x541   : > { %v1293_v24 = vmul.f32 1.442695, %v1292_v23 }
 0x542   : > { %v1301_v25 = vpop.permute.xlu0 %1300 }
 0x543   : > { %3739 = vpow2.f32 %v1293_v24  ;;  %3460 = vmatpush3.msra.mxu0 %v1301_v25 }
 0x544   : > { %3471 = vmatprep.subr.mxu0 %v4132_v9 }
 0x546   : > { %v1381_v26 = vpop.permute.xlu0 %1380 }
 0x547   : > { %3465 = vmatpush3.xpose.msk.msra.mxu1 %vm990_vm2, %v1381_v26 }
 0x548   : > { %3466 = vmatprep.subr.mxu1 %v4132_v9 }
 0x550   : > { %v3740_v27 = vpop.eup %3739 }
 0x551   : > { %v1295_v28 = vsel %vm990_vm2, %v3740_v27, 0.0 }
 0x552   : > { %1296 = vadd.xlane.f32.xlu1 %v1295_v28 }
 0x563   : > { %1378 = vrot.lane.b32.xlu1 %v4558_v31, %s4136_s23 }
 0x567   : > { %1376 = vrot.lane.b32.xlu1 %v4556_v30, %s4136_s23 }
 0x5db   : > { %v1297_v29 = vpop.xlane.xlu1 %1296 }
 0x5dc   : > { %3741 = vrcp.f32 %v1297_v29 }
 0x5df   : > { %v1379_v32 = vpop.permute.xlu1 %1378 }
 0x5e0   : > { %3467 = vmatpush3.xpose.msk.msra.mxu1 %vm990_vm2, %v1379_v32 }
 0x5e1   : > { %3481 = vmatprep.subr.mxu1 %v4132_v9 }
 0x5e3   : > { %v1377_v33 = vpop.permute.xlu1 %1376 }
 0x5e4   : > { %3469 = vmatmul.mubr.msk.f32.vlgmr.msra.gmra.mxu1 %vm990_vm2, %v1377_v33  ;;  %v972_v33 = vld [vmem:[#allocation12] sm:$0xff] }
 0x5e5   : > { %3483 = vmatprep.mubr.msk.f32.mxu1 %vm4133_vm1, %v4132_v9 }
 0x5e9   : > { %v3742_v35 = vpop.eup %3741 }
 0x5ea   : > { %v1299_v38 = vmul.f32 %v3742_v35, %v3740_v27 }
 0x5ec   : > { %3462 = vmatmul.mubr.msk.f32.vlgmr.msra.gmra.mxu0 %vm990_vm2, %v1299_v38  ;;  %v1977_v38 = vrot.slane %v4577_v36, 2 }
 0x5ed   : > { %3472 = vmatpush3.xpose.msk.msra.mxu0 %vm990_vm2, %v1379_v32  ;;  %3473 = vmatprep.mubr.msk.f32.mxu0 %vm4133_vm1, %v4132_v9 }
 0x5ee   : > { %3476 = vmatprep.subr.mxu0 %v4132_v9 }
 0x5f0   : > { %3474 = vmatmul.mubr.msk.f32.vlgmr.msra.gmra.mxu0 %vm990_vm2, %v1458_v39  ;;  %v2050_v39 = vrot.slane %v4589_v37, 2 }
 0x5f1   : > { %3477 = vmatpush3.xpose.msk.msra.mxu0 %vm990_vm2, %v1381_v26  ;;  %3478 = vmatprep.mubr.msk.f32.mxu0 %vm4133_vm1, %v4132_v9  ;;  %v973_v26 = vld [vmem:[#allocation12 + $0x8] sm:$0xff] }
 0x5f2   : > { %3486 = vmatprep.subr.mxu0 %v4132_v9 }
 0x5f4   : > { %3479 = vmatmul.mubr.msk.f32.vlgmr.msra.gmra.mxu0 %vm990_vm2, %v1531_v40 }
 0x5f5   : > { %3488 = vmatprep.mubr.msk.f32.mxu0 %vm4133_vm1, %v4132_v9  ;;  %3487 = vmatpush3.msra.mxu0 %v973_v26 }
 0x5f6   : > { %3496 = vmatprep.subr.mxu0 %v4132_v9 }
 0x6a4   : > { %v1454_v42 = vpop.f32.mrf.mxu1 }
 0x6a6   : > { %v3470_v43 = vpop.f32.mrf.mxu1 }
 0x6ac   : > { %v4693_v45 = vpop.f32.mrf.mxu0 }
 0x6ae   : > { %v3463_v46 = vpop.f32.mrf.mxu0 }
 0x6b0   : > { %v1527_v47 = vpop.f32.mrf.mxu0 }
 0x6b1   : > { %v1607_v4 = vrot.slane %v1527_v47, %v4603_v44 }
 0x6b2   : > { %v3475_v48 = vpop.f32.mrf.mxu0 }
 0x6b3   : > { %v1608_v13 = vadd.f32 %v1607_v4, %v1454_v42 }
 0x6b4   : > { %v1600_v49 = vpop.f32.mrf.mxu0 }
 0x6b5   : > { %v1612_v50 = vrot.slane %v1600_v49, %v4603_v44 }
 0x6b6   : > { %v3480_v51 = vpop.f32.mrf.mxu0 }
 0x6b7   : > { %1614 = vrot.lane.b32.xlu0 %v1612_v50, %s4134_s20 }
 0x729   : > { %v1615_v52 = vpop.permute.xlu0 %1614 }
 0x72a   : > { %v1617_v53 = vadd.f32 %v1615_v52, %v1454_v42 }
 0x72c   : > { %1634 = vrot.lane.b32.xlu0 %v1617_v53, %s4138_s6  ;;  %1620 = vrot.lane.b32.xlu1 %v1617_v53, %s4135_s14  ;;  %v1618_v54 = vsel %vm5008_vm3, %v1617_v53, 0.0  ;;  %vm5063_vm3 = vcmask 31744  }
 0x730   : > { %1629 = vrot.lane.b32.xlu1 %v1617_v53, %s4137_s3  ;;  %1625 = vrot.lane.b32.xlu0 %v1618_v54, %s4136_s23 }
 0x734   : > { %1639 = vrot.lane.b32.xlu1 %v1617_v53, %s4139_s21  ;;  %1644 = vrot.lane.b32.xlu0 %v1617_v53, %s4140_s30 }
 0x738   : > { %1649 = vrot.lane.b32.xlu1 %v1617_v53, %s4141_s18  ;;  %1654 = vrot.lane.b32.xlu0 %v1617_v53, %s4142_s29 }
 0x79e   : > { %v1635_v55 = vpop.permute.xlu0 %1634  ;;  %v1621_v56 = vpop.permute.xlu1 %1620 }
 0x79f   : > { %v1623_v57 = vsel %vm1236_vm5, %v1621_v56, 0.0  ;;  %v1637_v63 = vsel %vm5062_vm10, %v1635_v55, 0.0  ;;  %vm5066_vm10 = vcmp.eq.s32.totalorder %v4598_v41, 5 }
 0x7a2   : > { %v1630_v58 = vpop.permute.xlu1 %1629  ;;  %v1626_v59 = vpop.permute.xlu0 %1625 }
 0x7a3   : > { %v1632_v60 = vsel %vm1247_vm6, %v1630_v58, 0.0  ;;  %v1628_v61 = vsel %vm1238_vm8, %v1623_v57, %v1626_v59 }
 0x7a4   : > { %v1633_v62 = vsel %vm5061_vm7, %v1632_v60, %v1628_v61  ;;  %vm5064_vm7 = vcmask 15360  }
 0x7a5   : > { %v1638_v2 = vsel %vm1256_vm11, %v1637_v63, %v1633_v62 }
 0x7a6   : > { %v1640_v0 = vpop.permute.xlu1 %1639  ;;  %v1645_v1 = vpop.permute.xlu0 %1644 }
 0x7a7   : > { %v1642_v3 = vsel %vm5063_vm3, %v1640_v0, 0.0  ;;  %v1647_v6 = vsel %vm1268_vm12, %v1645_v1, 0.0  ;;  %vm5065_vm3 = vcmp.eq.s32.totalorder %v4598_v41, 7 }
 0x7a8   : > { %v1643_v5 = vsel %vm1263_vm14, %v1642_v3, %v1638_v2 }
 0x7a9   : > { %v1648_v10 = vsel %vm1270_vm15, %v1647_v6, %v1643_v5 }
 0x7aa   : > { %v1650_v7 = vpop.permute.xlu1 %1649  ;;  %v1655_v8 = vpop.permute.xlu0 %1654 }
 0x7ab   : > { %v1652_v11 = vsel %vm5064_vm7, %v1650_v7, 0.0  ;;  %v1657_v12 = vsel %vm1282_vm0, %v1655_v8, 0.0  ;;  %vm5067_vm7 = vcmask 39936  }
 0x7ac   : > { %v1653_v14 = vsel %vm1277_vm4, %v1652_v11, %v1648_v10 }
 0x7ad   : > { %v1658_v15 = vsel %vm1284_vm9, %v1657_v12, %v1653_v14 }
 0x7ae   : > { %v1659_v16 = vadd.f32 %v1658_v15, %v1608_v13 }
 0x7b0   : > { %v1660_v18 = vsel %vm4654_vm13, -inf, %v1659_v16 }
 0x7b1   : > { %v1661_v19 = vmul.f32 0.35355338, %v1660_v18 }
 0x7b3   : > { %v1662_v20 = vsel %vm990_vm2, %v1661_v19, -inf }
 0x7b4   : > { %1663 = vmax.xlane.f32.xlu1 %v1662_v20 }
 0x7c5   : > { %1897 = vrot.lane.b32.xlu1 %v4558_v31, %s4145_s13 }
 0x7c9   : > { %1899 = vrot.lane.b32.xlu1 %v4560_v34, %s4145_s13 }
 0x83d   : > { %v1664_v21 = vpop.xlane.xlu1 %1663 }
 0x83e   : > { %v1665_v22 = vsub.f32 %v1661_v19, %v1664_v21 }
 0x840   : > { %v1666_v23 = vmul.f32 1.442695, %v1665_v22 }
 0x841   : > { %v1898_v35 = vpop.permute.xlu1 %1897 }
 0x842   : > { %3743 = vpow2.f32 %v1666_v23 }
 0x845   : > { %v1900_v40 = vpop.permute.xlu1 %1899 }
 0x84f   : > { %v3744_v24 = vpop.eup %3743 }
 0x850   : > { %v1668_v25 = vsel %vm990_vm2, %v3744_v24, 0.0 }
 0x851   : > { %1669 = vadd.xlane.f32.xlu0 %v1668_v25 }
 0x867   : > { %1673 = vrot.lane.b32.xlu0 %v4558_v31, %s4146_s12  ;;  %s3332_s12 = sshll.u32 %s4264_s0, 7 }
 0x86b   : > { %1895 = vrot.lane.b32.xlu0 %v4556_v30, %s4145_s13  ;;  %s5081_s13 = sld [smem:[#allocation30_spill]] }
 0x871   : > { %p5084_p6 = scmp.ne.s32.totalorder %s5081_s13, 0 }
 0x8da   : > { %v1670_v27 = vpop.xlane.xlu0 %1669 }
 0x8db   : > { %3745 = vrcp.f32 %v1670_v27 }
 0x8de   : > { %v1674_v28 = vpop.permute.xlu0 %1673 }
 0x8df   : > { %3482 = vmatpush3.msra.mxu1 %v1674_v28 }
 0x8e0   : > { %3491 = vmatprep.subr.mxu1 %v4132_v9 }
 0x8e2   : > { %v1896_v47 = vpop.permute.xlu0 %1895 }
 0x8e8   : > { %v3746_v29 = vpop.eup %3745 }
 0x8e9   : > { %v1672_v32 = vmul.f32 %v3746_v29, %v3744_v24 }
 0x8eb   : > { %3484 = vmatmul.mubr.msk.f32.vlgmr.msra.gmra.mxu1 %vm990_vm2, %v1672_v32 }
 0x8ec   : > { %3492 = vmatpush3.msra.mxu1 %v972_v33  ;;  %3493 = vmatprep.mubr.msk.f32.mxu1 %vm4133_vm1, %v4132_v9 }
 0x8ed   : > { %3503 = vmatprep.subr.mxu1 %v4132_v9 }
 0x8ef   : > { %3494 = vmatmul.mubr.msk.f32.vlgmr.msra.gmra.mxu1 %vm990_vm2, %v4693_v45 }
 0x8f0   : > { %3504 = vmatpush3.xpose.msk.msra.mxu1 %vm990_vm2, %v1898_v35  ;;  %3505 = vmatprep.mubr.msk.f32.mxu1 %vm4133_vm1, %v4132_v9 }
 0x8f1   : > { %3508 = vmatprep.subr.mxu1 %v4132_v9 }
 0x8f3   : > { %3506 = vmatmul.mubr.msk.f32.vlgmr.msra.gmra.mxu1 %vm990_vm2, %v1977_v38 }
 0x8f4   : > { %3509 = vmatpush3.xpose.msk.msra.mxu1 %vm990_vm2, %v1900_v40  ;;  %3510 = vmatprep.mubr.msk.f32.mxu1 %vm4133_vm1, %v4132_v9 }
 0x8f5   : > { %3518 = vmatprep.subr.mxu1 %v4132_v9 }
 0x8f7   : > { %3511 = vmatmul.mubr.msk.f32.vlgmr.msra.gmra.mxu1 %vm990_vm2, %v2050_v39 }
 0x8f8   : > { %3520 = vmatprep.mubr.msk.f32.mxu1 %vm4133_vm1, %v4132_v9 }
 0x9ab   : > { %v1745_v42 = vpop.f32.mrf.mxu1 }
 0x9ac   : > { %3489 = vmatmul.mubr.msk.f32.vlgmr.msra.gmra.mxu0 %vm990_vm2, %v1745_v42 }
 0x9ad   : > { %3497 = vmatpush3.xpose.msk.msra.mxu0 %vm990_vm2, %v1900_v40  ;;  %v3485_v43 = vpop.f32.mrf.mxu1  ;;  %3500 = vmatprep.mubr.msk.f32.mxu0 %vm4133_vm1, %v4132_v9 }
 0x9ae   : > { %3498 = vmatprep.subr.mxu0 %v4132_v9 }
 0x9af   : > { %v4764_v45 = vpop.f32.mrf.mxu1 }
 0x9b1   : > { %3499 = vmatpush3.xpose.msk.msra.mxu0 %vm990_vm2, %v1898_v35  ;;  %v3495_v46 = vpop.f32.mrf.mxu1  ;;  %v974_v35 = vld [vmem:[#allocation12 + $0x10] sm:$0xff] }
 0x9b2   : > { %3513 = vmatprep.subr.mxu0 %v4132_v9  ;;  %3519 = vmatpush3.msra.mxu1 %v974_v35  ;;  %v2424_v46 = vrot.slane %v4577_v36, 3 }
 0x9b3   : > { %v2046_v48 = vpop.f32.mrf.mxu1  ;;  %3530 = vmatprep.subr.mxu1 %v4132_v9 }
 0x9b4   : > { %3501 = vmatmul.mubr.msk.f32.vlgmr.msra.gmra.mxu0 %vm990_vm2, %v1896_v47  ;;  %v2126_v56 = vrot.slane %v2046_v48, %v4603_v44  ;;  %v2497_v48 = vrot.slane %v4589_v37, 3 }
 0x9b5   : > { %v3507_v49 = vpop.f32.mrf.mxu1  ;;  %3515 = vmatprep.mubr.msk.f32.mxu0 %vm4133_vm1, %v4132_v9 }
 0x9b7   : > { %v2119_v50 = vpop.f32.mrf.mxu1 }
 0x9b8   : > { %v2131_v51 = vrot.slane %v2119_v50, %v4603_v44 }
 0x9b9   : > { %v3512_v52 = vpop.f32.mrf.mxu1 }
 0x9ba   : > { %2133 = vrot.lane.b32.xlu1 %v2131_v51, %s4134_s20 }
 0xa2c   : > { %v2134_v55 = vpop.permute.xlu1 %2133 }
 0xa6c   : > { %v4773_v53 = vpop.f32.mrf.mxu0 }
 0xa6d   : > { %v1892_v50 = vadd.f32 %v4764_v45, %v4773_v53 }
 0xa6e   : > { %v3490_v54 = vpop.f32.mrf.mxu0 }
 0xa74   : > { %v1973_v57 = vpop.f32.mrf.mxu0 }
 0xa75   : > { %v2127_v58 = vadd.f32 %v2126_v56, %v1973_v57  ;;  %v2136_v59 = vadd.f32 %v2134_v55, %v1973_v57 }
 0xa76   : > { %v3502_v60 = vpop.f32.mrf.mxu0 }
 0xa77   : > { %2153 = vrot.lane.b32.xlu1 %v2136_v59, %s4138_s6  ;;  %2139 = vrot.lane.b32.xlu0 %v2136_v59, %s4135_s14  ;;  %v2137_v61 = vsel %vm5065_vm3, %v2136_v59, 0.0  ;;  %vm5068_vm3 = vcmask 31744  }
 0xa7b   : > { %2148 = vrot.lane.b32.xlu0 %v2136_v59, %s4137_s3  ;;  %2144 = vrot.lane.b32.xlu1 %v2137_v61, %s4136_s23 }
 0xa7f   : > { %2158 = vrot.lane.b32.xlu0 %v2136_v59, %s4139_s21  ;;  %2163 = vrot.lane.b32.xlu1 %v2136_v59, %s4140_s30 }
 0xa83   : > { %2168 = vrot.lane.b32.xlu0 %v2136_v59, %s4141_s18  ;;  %2173 = vrot.lane.b32.xlu1 %v2136_v59, %s4142_s29 }
 0xae9   : > { %v2154_v62 = vpop.permute.xlu1 %2153  ;;  %v2140_v63 = vpop.permute.xlu0 %2139 }
 0xaea   : > { %v2142_v0 = vsel %vm1236_vm5, %v2140_v63, 0.0  ;;  %v2156_v6 = vsel %vm5067_vm7, %v2154_v62, 0.0  ;;  %vm5070_vm7 = vcmp.eq.s32.totalorder %v4598_v41, 7 }
 0xaed   : > { %v2149_v1 = vpop.permute.xlu0 %2148  ;;  %v2145_v2 = vpop.permute.xlu1 %2144 }
 0xaee   : > { %v2151_v3 = vsel %vm1247_vm6, %v2149_v1, 0.0  ;;  %v2147_v4 = vsel %vm1238_vm8, %v2142_v0, %v2145_v2 }
 0xaef   : > { %v2152_v5 = vsel %vm5066_vm10, %v2151_v3, %v2147_v4  ;;  %vm5069_vm10 = vcmask 15360  }
 0xaf0   : > { %v2157_v10 = vsel %vm1256_vm11, %v2156_v6, %v2152_v5 }
 0xaf1   : > { %v2159_v7 = vpop.permute.xlu0 %2158  ;;  %v2164_v8 = vpop.permute.xlu1 %2163 }
 0xaf2   : > { %v2161_v11 = vsel %vm5068_vm3, %v2159_v7, 0.0  ;;  %v2166_v13 = vsel %vm1268_vm12, %v2164_v8, 0.0  ;;  %vm5071_vm3 = vcmp.eq.s32.totalorder %v4598_v41, 5  ;;  %v975_v41 = vld [vmem:[#allocation12 + $0x18] sm:$0xff] }
 0xaf3   : > { %v2162_v12 = vsel %vm1263_vm14, %v2161_v11, %v2157_v10 }
 0xaf4   : > { %v2167_v16 = vsel %vm1270_vm15, %v2166_v13, %v2162_v12 }
 0xaf5   : > { %v2169_v14 = vpop.permute.xlu0 %2168  ;;  %v2174_v15 = vpop.permute.xlu1 %2173 }
 0xaf6   : > { %v2171_v18 = vsel %vm5069_vm10, %v2169_v14, 0.0  ;;  %v2176_v19 = vsel %vm1282_vm0, %v2174_v15, 0.0  ;;  %vm5072_vm10 = vcmask 39936  }
 0xaf7   : > { %v2172_v20 = vsel %vm1277_vm4, %v2171_v18, %v2167_v16 }
 0xaf8   : > { %v2177_v21 = vsel %vm1284_vm9, %v2176_v19, %v2172_v20 }
 0xaf9   : > { %v2178_v22 = vadd.f32 %v2177_v21, %v2127_v58 }
 0xafb   : > { %v2179_v23 = vsel %vm4654_vm13, -inf, %v2178_v22 }
 0xafc   : > { %v2180_v24 = vmul.f32 0.35355338, %v2179_v23 }
 0xafe   : > { %v2181_v25 = vsel %vm990_vm2, %v2180_v24, -inf }
 0xaff   : > { %2182 = vmax.xlane.f32.xlu0 %v2181_v25 }
 0xb15   : > { %2192 = vrot.lane.b32.xlu0 %v4558_v31, %s4147_s1  ;;  %s708_s1 = scalar_lea.vmem [#allocation18], %s3273_s17 }
 0xb19   : > { %2346 = vrot.lane.b32.xlu0 %v4560_v34, %s4148_s28 }
 0xb88   : > { %v2183_v26 = vpop.xlane.xlu0 %2182 }
 0xb89   : > { %v2184_v27 = vsub.f32 %v2180_v24, %v2183_v26 }
 0xb8b   : > { %v2185_v28 = vmul.f32 1.442695, %v2184_v27 }
 0xb8c   : > { %v2193_v29 = vpop.permute.xlu0 %2192 }
 0xb8d   : > { %3747 = vpow2.f32 %v2185_v28  ;;  %3514 = vmatpush3.msra.mxu0 %v2193_v29 }
 0xb8e   : > { %3523 = vmatprep.subr.mxu0 %v4132_v9 }
 0xb90   : > { %v2347_v40 = vpop.permute.xlu0 %2346 }
 0xb9a   : > { %v3748_v32 = vpop.eup %3747 }
 0xb9b   : > { %v2187_v33 = vsel %vm990_vm2, %v3748_v32, 0.0 }
 0xb9c   : > { %2188 = vadd.xlane.f32.xlu1 %v2187_v33 }
 0xbad   : > { %2344 = vrot.lane.b32.xlu1 %v4558_v31, %s4148_s28 }
 0xbb1   : > { %2342 = vrot.lane.b32.xlu1 %v4556_v30, %s4148_s28  ;;  %s3095_s28 = sshll.u32 %s708_s1, 4  ;;  %s3096_s28 = int_to_ptr.vmem [resolvable:$true] %s3095_s28 }
 0xc25   : > { %v2189_v34 = vpop.xlane.xlu1 %2188 }
 0xc26   : > { %3749 = vrcp.f32 %v2189_v34  ;;  %v2792_v34 = vld [vmem:[#allocation14 + $0x18] sm:$0xff] }
 0xc29   : > { %v2345_v42 = vpop.permute.xlu1 %2344 }
 0xc2d   : > { %v2343_v30 = vpop.permute.xlu1 %2342 }
 0xc33   : > { %v3750_v38 = vpop.eup %3749 }
 0xc34   : > { %v2191_v39 = vmul.f32 %v3750_v38, %v3748_v32  ;;  %v2797_v38 = vld [vmem:[#allocation15 + $0x18] sm:$0xff] }
 0xc36   : > { %3516 = vmatmul.mubr.msk.f32.vlgmr.msra.gmra.mxu0 %vm990_vm2, %v2191_v39 }
 0xc37   : > { %3524 = vmatpush3.xpose.msk.msra.mxu0 %vm990_vm2, %v2347_v40  ;;  %3527 = vmatprep.mubr.msk.f32.mxu0 %vm4133_vm1, %v4132_v9 }
 0xc38   : > { %3525 = vmatprep.subr.mxu0 %v4132_v9 }
 0xc3b   : > { %3526 = vmatpush3.xpose.msk.msra.mxu0 %vm990_vm2, %v2345_v42 }
 0xc3c   : > { %3540 = vmatprep.subr.mxu0 %v4132_v9 }
 0xc3e   : > { %3528 = vmatmul.mubr.msk.f32.vlgmr.msra.gmra.mxu0 %vm990_vm2, %v2343_v30  ;;  %v2795_v30 = vld [vmem:[#allocation15 + $0x8] sm:$0xff] }
 0xc3f   : > { %3542 = vmatprep.mubr.msk.f32.mxu0 %vm4133_vm1, %v4132_v9 }
 0xcf6   : > { %v2264_v43 = vpop.f32.mrf.mxu0 }
 0xcf7   : > { %3521 = vmatmul.mubr.msk.f32.vlgmr.msra.gmra.mxu1 %vm990_vm2, %v2264_v43  ;;  %v2790_v43 = vld [vmem:[#allocation14 + $0x8] sm:$0xff] }
 0xcf8   : > { %3531 = vmatpush3.xpose.msk.msra.mxu1 %vm990_vm2, %v2345_v42  ;;  %v3517_v47 = vpop.f32.mrf.mxu0  ;;  %3532 = vmatprep.mubr.msk.f32.mxu1 %vm4133_vm1, %v4132_v9 }
 0xcf9   : > { %3535 = vmatprep.subr.mxu1 %v4132_v9  ;;  %v2789_v47 = vld [vmem:[#allocation14] sm:$0xff] }
 0xcfb   : > { %3533 = vmatmul.mubr.msk.f32.vlgmr.msra.gmra.mxu1 %vm990_vm2, %v2424_v46  ;;  %v2794_v46 = vld [vmem:[#allocation15] sm:$0xff] }
 0xcfc   : > { %3536 = vmatpush3.xpose.msk.msra.mxu1 %vm990_vm2, %v2347_v40  ;;  %3537 = vmatprep.mubr.msk.f32.mxu1 %vm4133_vm1, %v4132_v9  ;;  %v2796_v40 = vld [vmem:[#allocation15 + $0x10] sm:$0xff] }
 0xcfd   : > { %3545 = vmatprep.subr.mxu1 %v4132_v9 }
 0xcfe   : > { %v2420_v36 = vpop.f32.mrf.mxu0 }
 0xcff   : > { %3538 = vmatmul.mubr.msk.f32.vlgmr.msra.gmra.mxu1 %vm990_vm2, %v2497_v48  ;;  %v3765_v48 = vld [vmem:[%s4489_s4] sm:$0xff]  ;;  %s5082_s4 = sld [smem:[#allocation42_spill]] }
 0xd00   : > { %v3529_v49 = vpop.f32.mrf.mxu0  ;;  %3547 = vmatprep.mubr.msk.f32.mxu1 %vm4133_vm1, %v4132_v9  ;;  %3546 = vmatpush3.msra.mxu1 %v975_v41 }
 0xd01   : > { %3561 = vmatprep.subr.mxu1 %v4132_v9 }
 0xdb7   : > { %v2337_v37 = vpop.f32.mrf.mxu1 }
 0xdb8   : > { %v4844_v51 = vadd.f32 %v2337_v37, %v1892_v50 }
 0xdb9   : > { %v3522_v52 = vpop.f32.mrf.mxu1 }
 0xdbb   : > { %v2493_v54 = vpop.f32.mrf.mxu1 }
 0xdbc   : > { %v2573_v10 = vrot.slane %v2493_v54, %v4603_v44  ;;  %v2802_v54 = vld [vmem:[#allocation17 + $0x18] sm:$0xff] }
 0xdbd   : > { %v3534_v55 = vpop.f32.mrf.mxu1 }
 0xdbe   : > { %v2574_v19 = vadd.f32 %v2573_v10, %v2420_v36  ;;  %v2801_v55 = vld [vmem:[#allocation17 + $0x10] sm:$0xff] }
 0xdbf   : > { %v2566_v56 = vpop.f32.mrf.mxu1 }
 0xdc0   : > { %v2578_v57 = vrot.slane %v2566_v56, %v4603_v44  ;;  %v2800_v56 = vld [vmem:[#allocation17 + $0x8] sm:$0xff] }
 0xdc1   : > { %v3539_v58 = vpop.f32.mrf.mxu1 }
 0xdc2   : > { %2580 = vrot.lane.b32.xlu0 %v2578_v57, %s4134_s20  ;;  %v2799_v57 = vld [vmem:[#allocation17] sm:$0xff]  ;;  %s4927_s20 = scalar_lea.hbm %s5082_s4, %s3332_s12 }
 0xe34   : > { %v2581_v59 = vpop.permute.xlu0 %2580 }
 0xe35   : > { %v2583_v60 = vadd.f32 %v2581_v59, %v2420_v36 }
 0xe37   : > { %2600 = vrot.lane.b32.xlu0 %v2583_v60, %s4138_s6  ;;  %2586 = vrot.lane.b32.xlu1 %v2583_v60, %s4135_s14  ;;  %v2584_v45 = vsel %vm5070_vm7, %v2583_v60, 0.0  ;;  %vm5073_vm7 = vcmask 31744   ;;  %s5077_s14 = sld [smem:[#allocation40_spill]] }
 0xe38   : > { %s5078_s6 = sld [smem:[#allocation38_spill]] }
 0xe3b   : > { %2595 = vrot.lane.b32.xlu1 %v2583_v60, %s4137_s3  ;;  %2591 = vrot.lane.b32.xlu0 %v2584_v45, %s4136_s23  ;;  %s4030_s23 = scalar_lea.vmem %s3096_s28, 128 }
 0xe3c   : > { %p4031_p10 = scmp.ne.s32.totalorder %s3096_s28, %s4030_s23 }
 0xe3e   : > { %v3324_v58 = vld [vmem:[%s5078_s6] ss:$0 sm:$0xff]  ;;  %p4032_p0 = pnand %p4031_p10, %p5084_p6 }
 0xe3f   : > { %2605 = vrot.lane.b32.xlu1 %v2583_v60, %s4139_s21  ;;  %2610 = vrot.lane.b32.xlu0 %v2583_v60, %s4140_s30  ;;  %s4151_s21 = smov 64  }
 0xe40   : > { %p4033_p3 = pneg %p4032_p0 }
 0xe43   : > { %2615 = vrot.lane.b32.xlu1 %v2583_v60, %s4141_s18  ;;  %2620 = vrot.lane.b32.xlu0 %v2583_v60, %s4142_s29  ;;  %s5080_s29 = sld [smem:[#allocation41_spill]] }
 0xea9   : > { %v2601_v53 = vpop.permute.xlu0 %2600  ;;  %v2587_v61 = vpop.permute.xlu1 %2586 }
 0xeaa   : > { %v2589_v62 = vsel %vm1236_vm5, %v2587_v61, 0.0  ;;  %v2603_v4 = vsel %vm5072_vm10, %v2601_v53, 0.0  ;;  %vm5074_vm5 = vcmask 15360  }
 0xead   : > { %v2596_v63 = vpop.permute.xlu1 %2595  ;;  %v2592_v0 = vpop.permute.xlu0 %2591 }
 0xeae   : > { %v2598_v1 = vsel %vm1247_vm6, %v2596_v63, 0.0  ;;  %v2594_v2 = vsel %vm1238_vm8, %v2589_v62, %v2592_v0 }
 0xeaf   : > { %v2599_v3 = vsel %vm5071_vm3, %v2598_v1, %v2594_v2 }
 0xeb0   : > { %v2604_v7 = vsel %vm1256_vm11, %v2603_v4, %v2599_v3 }
 0xeb1   : > { %v2606_v5 = vpop.permute.xlu1 %2605  ;;  %v2611_v6 = vpop.permute.xlu0 %2610 }
 0xeb2   : > { %v2608_v8 = vsel %vm5073_vm7, %v2606_v5, 0.0  ;;  %v2613_v12 = vsel %vm1268_vm12, %v2611_v6, 0.0  ;;  %v3330_v5 = vld [vmem:[%s5080_s29] ss:$0 sm:$0xff] }
 0xeb3   : > { %v2609_v11 = vsel %vm1263_vm14, %v2608_v8, %v2604_v7 }
 0xeb4   : > { %v2614_v15 = vsel %vm1270_vm15, %v2613_v12, %v2609_v11 }
 0xeb5   : > { %v2616_v13 = vpop.permute.xlu1 %2615  ;;  %v2621_v14 = vpop.permute.xlu0 %2620 }
 0xeb6   : > { %v2618_v16 = vsel %vm5074_vm5, %v2616_v13, 0.0  ;;  %v2623_v18 = vsel %vm1282_vm0, %v2621_v14, 0.0  ;;  %vm5075_vm0 = vcmask 261120  }
 0xeb7   : > { %v2619_v20 = vsel %vm1277_vm4, %v2618_v16, %v2614_v15  ;;  %vm5083_vm6 = vmmov %vm5075_vm0 }
 0xeb8   : > { %v2624_v44 = vsel %vm1284_vm9, %v2623_v18, %v2619_v20 }
 0xeb9   : > { %v2625_v21 = vadd.f32 %v2624_v44, %v2574_v19 }
 0xebb   : > { %v2626_v22 = vsel %vm4654_vm13, -inf, %v2625_v21 }
 0xebc   : > { %v2627_v23 = vmul.f32 0.35355338, %v2626_v22 }
 0xebe   : > { %v2628_v24 = vsel %vm990_vm2, %v2627_v23, -inf }
 0xebf   : > { %2629 = vmax.xlane.f32.xlu1 %v2628_v24 }
 0xf48   : > { %v2630_v25 = vpop.xlane.xlu1 %2629 }
 0xf49   : > { %v2631_v26 = vsub.f32 %v2627_v23, %v2630_v25 }
 0xf4b   : > { %v2632_v27 = vmul.f32 1.442695, %v2631_v26 }
 0xf4d   : > { %3751 = vpow2.f32 %v2632_v27 }
 0xf5a   : > { %v3752_v28 = vpop.eup %3751 }
 0xf5b   : > { %v2634_v29 = vsel %vm990_vm2, %v3752_v28, 0.0 }
 0xf5c   : > { %2635 = vadd.xlane.f32.xlu0 %v2634_v29 }
 0xf72   : > { %2639 = vrot.lane.b32.xlu0 %v4558_v31, %s4149_s19  ;;  %v2791_v31 = vld [vmem:[#allocation14 + $0x10] sm:$0xff] }
 0xf76   : > { %3066 = vrot.lane.b32.xlu0 %v3765_v48, %s4150_s24 }
 0xfe5   : > { %v2636_v17 = vpop.xlane.xlu0 %2635 }
 0xfe6   : > { %3753 = vrcp.f32 %v2636_v17 }
 0xfe9   : > { %v2640_v32 = vpop.permute.xlu0 %2639 }
 0xfea   : > { %3541 = vmatpush3.msra.mxu0 %v2640_v32 }
 0xfeb   : > { %3550 = vmatprep.subr.mxu0 %v4132_v9 }
 0xfed   : > { %v3067_v20 = vpop.permute.xlu0 %3066 }
 0xff3   : > { %v3754_v33 = vpop.eup %3753 }
 0xff4   : > { %v2638_v35 = vmul.f32 %v3754_v33, %v3752_v28 }
 0xff6   : > { %3543 = vmatmul.mubr.msk.f32.vlgmr.msra.gmra.mxu0 %vm990_vm2, %v2638_v35 }
 0xff7   : > { %3558 = vmatprep.mubr.msk.f32.mxu0 %vm4133_vm1, %v4132_v9  ;;  %3551 = vmatpush3.msra.mxu0 %v2792_v34 }
 0xff8   : > { %3552 = vmatprep.subr.mxu0 %v4132_v9 }
 0xff9   : > { %3553 = vmatpush3.msra.mxu0 %v2791_v31 }
 0xffa   : > { %3554 = vmatprep.subr.mxu0 %v4132_v9 }
 0xffb   : > { %3555 = vmatpush3.msra.mxu0 %v2790_v43 }
 0xffc   : > { %3556 = vmatprep.subr.mxu0 %v4132_v9 }
 0xffd   : > { %3557 = vmatpush3.msra.mxu0 %v2789_v47 }
 0xffe   : > { %3572 = vmatprep.subr.mxu0 %v4132_v9 }
0x10b6   : > { %v2711_v39 = vpop.f32.mrf.mxu0 }
0x10b7   : > { %3548 = vmatmul.mubr.msk.f32.vlgmr.msra.gmra.mxu1 %vm990_vm2, %v2711_v39  ;;  %vm5076_vm2 = vmmov %vm5075_vm0 }
0x10b8   : > { %v3544_v42 = vpop.f32.mrf.mxu0  ;;  %3562 = vmatpush3.msra.mxu1 %v2797_v38  ;;  %3569 = vmatprep.mubr.msk.f32.mxu1 %vm4133_vm1, %v4132_v9 }
0x10b9   : > { %3563 = vmatprep.subr.mxu1 %v4132_v9 }
0x10ba   : > { %3564 = vmatpush3.msra.mxu1 %v2796_v40 }
0x10bb   : > { %3565 = vmatprep.subr.mxu1 %v4132_v9 }
0x10bc   : > { %3566 = vmatpush3.msra.mxu1 %v2795_v30 }
0x10bd   : > { %3567 = vmatprep.subr.mxu1 %v4132_v9 }
0x10be   : > { %3568 = vmatpush3.msra.mxu1 %v2794_v46 }
0x10bf   : > { %3570 = vmatmul.mubr.msk.f32.vlgmr.msra.gmra.mxu1 %vm5075_vm0, %v3765_v48 }
0x1177   : > { %v2784_v36 = vpop.f32.mrf.mxu1 }
0x1178   : > { %v2788_v49 = vadd.f32 %v2784_v36, %v4844_v51  ;;  %v3326_v51 = vld [vmem:[%s5077_s14] ss:$0 sm:$0xff]  ;;  %s3082_s14 = scalar_lea.sflag [#allocation4], %s4484_s22 }
0x1179   : > { %v3549_v50 = vpop.f32.mrf.mxu1 }
0x117a   : > { %3559 = vmatmul.mubr.msk.f32.vlgmr.msra.gmra.mxu0 %vm5076_vm2, %v2788_v49 }
0x117b   : > { %3580 = vmatprep.mubr.msk.f32.mxu0 %vm4133_vm1, %v4132_v9  ;;  %3573 = vmatpush3.msra.mxu0 %v2802_v54  ;;  %vm5079_vm1 = vmmov %vm5075_vm0 }
0x117c   : > { %3574 = vmatprep.subr.mxu0 %v4132_v9 }
0x117d   : > { %3575 = vmatpush3.msra.mxu0 %v2801_v55 }
0x117e   : > { %3576 = vmatprep.subr.mxu0 %v4132_v9 }
0x117f   : > { %v2958_v37 = vpop.f32.mrf.mxu1  ;;  %3577 = vmatpush3.msra.mxu0 %v2800_v56 }
0x1180   : > { %3578 = vmatprep.subr.mxu0 %v4132_v9  ;;  %v2959_v59 = vadd.f32 %v3326_v51, %v2958_v37 }
0x1181   : > { %v3571_v52 = vpop.f32.mrf.mxu1  ;;  %3579 = vmatpush3.msra.mxu0 %v2799_v57 }
0x123a   : > { %v2879_v60 = vpop.f32.mrf.mxu0 }
0x123b   : > { %v2880_v45 = vadd.f32 %v3324_v58, %v2879_v60 }
0x123c   : > { %v3560_v53 = vpop.f32.mrf.mxu0 }
0x123d   : > { %v2962_v61 = vadd.f32 %v2959_v59, %v2880_v45 }
0x123f   : > { %v2963_v62 = vsub.f32 0.0, %v2962_v61  ;;  %v3328_v12 = vadd.f32 -0.1, %v2962_v61 }
0x1241   : > { %v2964_v63 = vmul.f32 1.442695, %v2963_v62  ;;  %v2970_v13 = vsub.f32 0.0, %v3328_v12 }
0x1243   : > { %3755 = vpow2.f32 %v2964_v63  ;;  %v2971_v14 = vmul.f32 1.442695, %v2970_v13 }
0x1250   : > { %v3756_v0 = vpop.eup %3755 }
0x1251   : > { %v2966_v1 = vadd.f32 1.0, %v3756_v0 }
0x1253   : > { %3757 = vrcp.f32 %v2966_v1 }
0x1260   : > { %v3758_v9 = vpop.eup %3757 }
0x1261   : > { %v2976_v2 = vmul.f32 %v3765_v48, %v3758_v9 }
0x1263   : > { %3581 = vmatmul.mubr.msk.f32.vlgmr.msra.gmra.mxu0 %vm5079_vm1, %v2976_v2 }
0x1323   : > { %v3046_v3 = vpop.f32.mrf.mxu0 }
0x1324   : > { %3051 = vrot.lane.b32.xlu1 %v3046_v3, %s4151_s21 }
0x1325   : > { %v3582_v4 = vpop.f32.mrf.mxu0 }
0x1328   : > { %3060 = vrot.lane.b32.xlu1 %v3330_v5, %s4151_s21 }
0x1396   : > { %v3052_v6 = vpop.permute.xlu1 %3051 }
0x1397   : > { %v3054_v7 = vadd.f32 %v3052_v6, %v2880_v45 }
0x139a   : > { %v3061_v8 = vpop.permute.xlu1 %3060 }
0x139b   : > { %v3063_v10 = vadd.f32 %v3061_v8, %v3054_v7 }
0x139d   : > { %3759 = vtanh.f32 %v3063_v10 }
0x139e   : > { %3761 = vpow2.f32 %v2971_v14 }
0x13aa   : > { %v3760_v11 = vpop.eup %3759 }
0x13ab   : > { %3071 = vrot.lane.b32.xlu1 %v3760_v11, %s4144_s8  ;;  %v3762_v15 = vpop.eup %3761 }
0x13ac   : > { %v2973_v16 = vadd.f32 1.0, %v3762_v15 }
0x13ae   : > { %3763 = vrcp.f32 %v2973_v16 }
0x13bb   : > { %v3764_v18 = vpop.eup %3763 }
0x13bc   : > { %v3065_v19 = vsub.f32 1.0, %v3764_v18 }
0x13be   : > { %v3069_v21 = vmul.f32 %v3067_v20, %v3065_v19 }
0x141d   : > { %v3072_v44 = vpop.permute.xlu1 %3071 }
0x141e   : > { %v3074_v22 = vmul.f32 %v3764_v18, %v3072_v44 }
0x1420   : > { %v3075_v23 = vadd.f32 %v3074_v22, %v3069_v21 }
0x1422   : > { %3077 = vrot.lane.b32.xlu0 %v3075_v23, %s4144_s8  ;;  %s4152_s8 = smov [#allocation18]  }
0x1423   : > { %s4034_s0 = sshll.u32 %s4152_s8, 4  ;;  %s4035_s0 = int_to_ptr.vmem [resolvable:$false] %s4034_s0 }
0x1424   : > { %s4036_s17 = scalar_lea.vmem %s4035_s0, 256  ;;  %p4037_p11 = scmp.lt.s32.totalorder %s3096_s28, %s4035_s0 }
0x1425   : > { %p4038_p12 = scmp.lt.s32.totalorder %s4036_s17, %s4030_s23 }
0x1427   : > { %p4039_p2 = por %p4038_p12, %p4037_p11 }
0x1429   : > { %p4040_p13 = pnand %p4039_p2, %p4033_p3 }
0x1494   : > { %v3078_v24 = vpop.permute.xlu0 %3077 }
0x1495   : > { %3080 = vst.msk [vmem:[%s708_s1] sm:$0xff] %vm5083_vm6, %v3078_v24 }
0x1496   : > { %4043 = shalt.err (!%p4040_p13)
}
0x1497   : > { %s4044_s3 = scalar_lea.hbm %s4927_s20, 128  ;;  %s4048_s21 = scalar_lea.hbm %s5082_s4, 256 }
0x1498   : > { %p4045_p1 = scmp.ne.s32.totalorder %s4927_s20, %s4044_s3  ;;  %p4049_p5 = scmp.lt.s32.totalorder %s4927_s20, %s5082_s4 }
0x1499   : > { %p4050_p8 = scmp.lt.s32.totalorder %s4048_s21, %s4044_s3 }
0x149a   : > { %p4046_p4 = pnand %p4045_p1, %p5084_p6 }
0x149b   : > { %p4051_p7 = por %p4050_p8, %p4049_p5 }
0x149c   : > { %p4047_p9 = pneg %p4046_p4 }
0x149e   : > { %p4052_p10 = pnand %p4051_p7, %p4047_p9 }
0x14a0   : > { %4055 = shalt.err (!%p4052_p10)
}
0x14a1   : > { %3619 = dma.vmem_to_hbm [thread:$0]  (%p5084_p6), %s3096_s28, 128, %s4927_s20, %s3082_s14  }
0x14a2 PF: > { %s5085_s29 = sld [smem:[#allocation27_spill]]  ;;  %p5088_p3 = scmp.ge.s32.totalorder %s4118_s27, 2 }
0x14a3   : > { %s5086_s12 = sld [smem:[#allocation31_spill]] }
0x14a8   : > { %s3107_s1 = sand.u32 1, %s5085_s29  }
0x14a9   : > { %p5087_p0 = scmp.ne.s32.totalorder %s5086_s12, 0  ;;  %s3108_s19 = scalar_lea.sflag [#allocation4], %s3107_s1 }
0x14ab   : > { %p3654_p11 = pnand %p5088_p3, %p5087_p0 }
0x14ad   : > { %p3655_p12 = pneg %p3654_p11 }
0x14af   : > { %4101 = dma.done.wait (%p3655_p12), %s3108_s19, 128  }
0x14b0   : > { %4103 = vsyncadd (%p3655_p12), %s3108_s19, 4294967168  ;;  %s5089_s27 = sld [smem:[#allocation28_spill]]  ;;  %s5091_s24 = smov %s4110_s25 }
0x14b1   : > { %s5090_s23 = sld [smem:[#allocation29_spill]]  ;;  %s5092_s25 = smov %s4114_s26 }
0x14b6   : > { %p34_p2 = scmp.ge.s32.totalorder %s5089_s27, 4  }
0x14b7   : > { %s5093_s26 = smov %s5090_s23 }
0x14b8   :  { %36 = sbr.rel (!%p34_p2) target bundleno = 21 (0x15), region = 176 }
0x14bd   :  { %3113 = vsyncpa [#allocation3], 1 }
0x14be   :  { %3115 = vsyncpa [#allocation3 + $0x1], 1 }
0x14bf   :  { %3116 = vsyncpa [#allocation6], 1 }
0x14c0   :  { %3117 = vsyncpa [#allocation10], 1 }
0x14c1   :  { %3118 = vsyncpa [#allocation13], 1 }
0x14c2   :  { %3119 = vsyncpa [#allocation16], 1 }
0x14c3   :  { %3120 = vsyncpa [#allocation4], 1 }
0x14c4   :  { %3122 = vsyncpa [#allocation4 + $0x1], 1 }

</bundles_post_ra>
